<compile_context>
chip_gen: v6e
topology: v6e:2x2x1
jax: 0.10.0
libtpu: 0.0.40
codegen_flags: <defaults>
</compile_context>

<pallas_src>
import functools

import jax
import jax.numpy as jnp
from jax import lax
from jax.experimental import pallas as pl
from jax.experimental.pallas import tpu as pltpu

HP = 128  # padded hidden / gate lane width (one full vreg lane block)


def decoder_kernel(h0_ref, enc_ref, emb_ref,
                   wcat_ref, ball_ref,
                   attn_w_ref, attn_b_ref,
                   aw_w_ref, aw_b_ref,
                   out_w_ref, out_b_ref,
                   logits_ref,
                   xh_scr):
    s = pl.program_id(0)
    B = h0_ref.shape[0]
    V = emb_ref.shape[0]

    # ---- step 0: seed recurrent state: x = embed(start token 0), h = h0 ----
    @pl.when(s == 0)
    def _():
        xh_scr[:, 0:HP] = jnp.broadcast_to(emb_ref[0:1, :], (B, HP))
        xh_scr[:, HP:2 * HP] = h0_ref[...]

    xh = xh_scr[...]                      # (B, 2*HP)   [x | h], both 128-padded
    h = xh[:, HP:2 * HP]                  # (B, HP)

    # ---- GRU cell: ONE fused MXU matmul; 128-lane-aligned gate blocks ----
    # column blocks of g: [r_combined | z_combined | gi_n | gh_n]
    g = jnp.dot(xh, wcat_ref[...], preferred_element_type=jnp.float32) + ball_ref[...]
    r = jax.nn.sigmoid(g[:, 0:HP])
    z = jax.nn.sigmoid(g[:, HP:2 * HP])
    n = jnp.tanh(g[:, 2 * HP:3 * HP] + r * g[:, 3 * HP:4 * HP])
    h_new = (1.0 - z) * n + z * h         # (B, HP); padded lanes stay exactly 0

    # ---- attention ----
    # TODO(synk): the original `Attention(args)` class is not provided; this is
    # bilinear (Luong-general) attention producing a (B, 2H) context so the
    # downstream Linear(3H -> 3H) shapes match the reference module.
    proj = jnp.dot(h_new, attn_w_ref[...],
                   preferred_element_type=jnp.float32) + attn_b_ref[...]        # (B, 2H)
    enc = enc_ref[...]                                                          # (B, T, 2H)
    scores = jnp.sum(proj[:, None, :] * enc, axis=-1, keepdims=True)            # (B, T, 1)
    scores = scores - jnp.max(scores, axis=1, keepdims=True)
    e = jnp.exp(scores)
    w = e * pl.reciprocal(jnp.sum(e, axis=1, keepdims=True), approx=True)       # (B, T, 1)
    ctx = jnp.sum(w * enc, axis=1)                                              # (B, 2H)

    # ---- concat -> Linear(3H,3H) -> ReLU -> Linear(3H,V) (padded layouts) ----
    cat = jnp.concatenate([h_new, ctx], axis=-1)                                # (B, HP+2H)
    hid = jnp.dot(cat, aw_w_ref[...],
                  preferred_element_type=jnp.float32) + aw_b_ref[...]           # (B, HP)
    hid = jnp.maximum(hid, 0.0)
    logits = jnp.dot(hid, out_w_ref[...],
                     preferred_element_type=jnp.float32) + out_b_ref[...]       # (B, V)
    logits_ref[0] = logits

    # ---- greedy next token: argmax -> one-hot -> embedding, all in-kernel ----
    ids = lax.broadcasted_iota(jnp.int32, (B, V), 1).astype(jnp.float32)
    mx = jnp.max(logits, axis=-1, keepdims=True)
    idx = jnp.min(jnp.where(logits == mx, ids, float(V)), axis=-1, keepdims=True)
    onehot = (ids == idx).astype(jnp.float32)                                   # (B, V)
    x_next = jnp.dot(onehot, emb_ref[...],
                     preferred_element_type=jnp.float32)                        # (B, HP)

    # carry state to the next grid step
    xh_scr[:, 0:HP] = x_next
    xh_scr[:, HP:2 * HP] = h_new


def make_decoder_call(B, T, S, V, H):
    H2 = 2 * H
    grid_spec = pltpu.PrefetchScalarGridSpec(
        num_scalar_prefetch=0,
        grid=(S,),
        in_specs=[
            pl.BlockSpec((B, HP), lambda s: (0, 0)),            # h0 (padded)
            pl.BlockSpec((B, T, H2), lambda s: (0, 0, 0)),      # encoder output
            pl.BlockSpec((V, HP), lambda s: (0, 0)),            # embedding (padded)
            pl.BlockSpec((2 * HP, 4 * HP), lambda s: (0, 0)),   # fused GRU weights
            pl.BlockSpec((1, 4 * HP), lambda s: (0, 0)),        # fused GRU biases
            pl.BlockSpec((HP, H2), lambda s: (0, 0)),           # attn proj W
            pl.BlockSpec((1, H2), lambda s: (0, 0)),            # attn proj b
            pl.BlockSpec((HP + H2, HP), lambda s: (0, 0)),      # attention_wight W
            pl.BlockSpec((1, HP), lambda s: (0, 0)),            # attention_wight b
            pl.BlockSpec((HP, V), lambda s: (0, 0)),            # out W
            pl.BlockSpec((1, V), lambda s: (0, 0)),             # out b
        ],
        out_specs=pl.BlockSpec((1, B, V), lambda s: (s, 0, 0)),
        scratch_shapes=[pltpu.VMEM((B, 2 * HP), jnp.float32)],  # [x | h] carry
    )
    return pl.pallas_call(
        decoder_kernel,
        out_shape=jax.ShapeDtypeStruct((S, B, V), jnp.float32),
        grid_spec=grid_spec,
        compiler_params=pltpu.CompilerParams(
            dimension_semantics=("arbitrary",)),
    )


def init_params(key, V, E, H):
    ks = jax.random.split(key, 11)
    s = 0.1
    return dict(
        emb_table=jax.random.normal(ks[0], (V, E), jnp.float32) * s,
        # GRU weights, stored transposed (in, 3H); gate order r, z, n (PyTorch)
        w_ih=jax.random.normal(ks[1], (E, 3 * H), jnp.float32) * s,
        w_hh=jax.random.normal(ks[2], (H, 3 * H), jnp.float32) * s,
        b_ih=jax.random.normal(ks[3], (1, 3 * H), jnp.float32) * s,
        b_hh=jax.random.normal(ks[4], (1, 3 * H), jnp.float32) * s,
        # attention projection H -> 2H
        attn_w=jax.random.normal(ks[5], (H, 2 * H), jnp.float32) * s,
        attn_b=jax.random.normal(ks[6], (1, 2 * H), jnp.float32) * s,
        # attention_wight: Linear(3H, 3H)
        aw_w=jax.random.normal(ks[7], (3 * H, 3 * H), jnp.float32) * s,
        aw_b=jax.random.normal(ks[8], (1, 3 * H), jnp.float32) * s,
        # out: Linear(3H, V)
        out_w=jax.random.normal(ks[9], (3 * H, V), jnp.float32) * s,
        out_b=jax.random.normal(ks[10], (1, V), jnp.float32) * s,
    )


def pack_params(p, V, E, H):
    """Zero-pad everything to 128-lane gate blocks; fuse GRU W_ih/W_hh and biases."""
    H2, H3 = 2 * H, 3 * H
    f32 = jnp.float32

    emb_pad = jnp.zeros((V, HP), f32).at[:, 0:E].set(p["emb_table"])

    # fused GRU weight: rows [0:HP)=x-part, [HP:2HP)=h-part
    # cols: [0:HP)=r (x+h), [HP:2HP)=z (x+h), [2HP:3HP)=gi_n (x), [3HP:4HP)=gh_n (h)
    w_cat = jnp.zeros((2 * HP, 4 * HP), f32)
    w_cat = w_cat.at[0:E, 0:H].set(p["w_ih"][:, 0:H])
    w_cat = w_cat.at[HP:HP + H, 0:H].set(p["w_hh"][:, 0:H])
    w_cat = w_cat.at[0:E, HP:HP + H].set(p["w_ih"][:, H:2 * H])
    w_cat = w_cat.at[HP:HP + H, HP:HP + H].set(p["w_hh"][:, H:2 * H])
    w_cat = w_cat.at[0:E, 2 * HP:2 * HP + H].set(p["w_ih"][:, 2 * H:3 * H])
    w_cat = w_cat.at[HP:HP + H, 3 * HP:3 * HP + H].set(p["w_hh"][:, 2 * H:3 * H])

    # fused biases: r/z gates pre-summed (b_ih+b_hh); n gate keeps halves separate
    b_all = jnp.zeros((1, 4 * HP), f32)
    b_all = b_all.at[:, 0:H].set(p["b_ih"][:, 0:H] + p["b_hh"][:, 0:H])
    b_all = b_all.at[:, HP:HP + H].set(p["b_ih"][:, H:2 * H] + p["b_hh"][:, H:2 * H])
    b_all = b_all.at[:, 2 * HP:2 * HP + H].set(p["b_ih"][:, 2 * H:3 * H])
    b_all = b_all.at[:, 3 * HP:3 * HP + H].set(p["b_hh"][:, 2 * H:3 * H])

    attn_w_pad = jnp.zeros((HP, H2), f32).at[0:H, :].set(p["attn_w"])

    # attention_wight expects cat = [h_new (H) | ctx (2H)]; padded cat is
    # [h_new (HP) | ctx (2H)], so the ctx rows move to offset HP.
    aw_w_pad = jnp.zeros((HP + H2, HP), f32)
    aw_w_pad = aw_w_pad.at[0:H, 0:H3].set(p["aw_w"][0:H, :])
    aw_w_pad = aw_w_pad.at[HP:HP + H2, 0:H3].set(p["aw_w"][H:H3, :])
    aw_b_pad = jnp.zeros((1, HP), f32).at[:, 0:H3].set(p["aw_b"])

    out_w_pad = jnp.zeros((HP, V), f32).at[0:H3, :].set(p["out_w"])

    return (emb_pad, w_cat, b_all, attn_w_pad, p["attn_b"],
            aw_w_pad, aw_b_pad, out_w_pad, p["out_b"])


@functools.partial(jax.jit, static_argnames=("H", "V", "E"))
def decoder_forward(params, encoder_output, encoder_hidden, q_words, *, H, V, E):
    """Mirrors Decoder.forward: returns (B, q_seq_len, vocab_size) logits."""
    B, T = encoder_output.shape[0], encoder_output.shape[1]
    S = q_words.shape[1]                                   # only shape is used

    (emb_pad, w_cat, b_all, attn_w_pad, attn_b,
     aw_w_pad, aw_b_pad, out_w_pad, out_b) = pack_params(params, V, E, H)

    # self.hidden = unsqueeze(encoder_hidden[0] + encoder_hidden[1], 0)
    h0 = encoder_hidden[0] + encoder_hidden[1]             # (B, H)
    h0_pad = jnp.zeros((B, HP), jnp.float32).at[:, 0:H].set(h0)

    call = make_decoder_call(B, T, S, V, H)
    logits_sbv = call(h0_pad, encoder_output, emb_pad, w_cat, b_all,
                      attn_w_pad, attn_b, aw_w_pad, aw_b_pad, out_w_pad, out_b)

    # torch stacks along dim 0 then transposes (0,1) -> (B, S, V)
    return jnp.transpose(logits_sbv, (1, 0, 2))


if __name__ == "__main__":
    # Small shapes consistent with the module.
    B, T, S = 8, 16, 8          # batch, encoder seq len, decoder (question) seq len
    V, E, H = 256, 32, 32       # vocab, embed, hidden

    key = jax.random.PRNGKey(0)
    k_p, k_enc, k_hid, k_q = jax.random.split(key, 4)

    params = init_params(k_p, V, E, H)
    encoder_output = jax.random.normal(k_enc, (B, T, 2 * H), jnp.float32)
    encoder_hidden = jax.random.normal(k_hid, (2, B, H), jnp.float32)
    q_words = jax.random.randint(k_q, (B, S), 0, V, dtype=jnp.int32)  # only shape used

    outputs = decoder_forward(params, encoder_output, encoder_hidden, q_words,
                              H=H, V=V, E=E)
    outputs = jax.block_until_ready(outputs)

    assert outputs.shape == (B, S, V), outputs.shape
    assert bool(jnp.all(jnp.isfinite(outputs)))
    print("KERNEL_OK")
</pallas_src>

<mosaic_0001>
module attributes {stable_mosaic.version = 11 : i64} {
  func.func @decoder_kernel(%arg0: i32, %arg1: memref<8x128xf32, #tpu.memory_space<vmem>>, %arg2: memref<8x16x64xf32, #tpu.memory_space<vmem>>, %arg3: memref<256x128xf32, #tpu.memory_space<vmem>>, %arg4: memref<256x512xf32, #tpu.memory_space<vmem>>, %arg5: memref<1x512xf32, #tpu.memory_space<vmem>>, %arg6: memref<128x64xf32, #tpu.memory_space<vmem>>, %arg7: memref<1x64xf32, #tpu.memory_space<vmem>>, %arg8: memref<192x128xf32, #tpu.memory_space<vmem>>, %arg9: memref<1x128xf32, #tpu.memory_space<vmem>>, %arg10: memref<128x256xf32, #tpu.memory_space<vmem>>, %arg11: memref<1x256xf32, #tpu.memory_space<vmem>>, %arg12: memref<1x8x256xf32, #tpu.memory_space<vmem>>, %arg13: memref<8x256xf32, #tpu.memory_space<vmem>>) attributes {dimension_semantics = [#tpu.dimension_semantics<arbitrary>], iteration_bounds = array<i64: 8>, scalar_prefetch = 0 : i64, scratch_operands = 1 : i64, tpu.core_type = #tpu.core_type<tc>, window_params = [{pipeline_mode = #tpu.pipeline_mode<synchronous>, transform_indices = @transform_0, window_bounds = array<i64: 8, 128>}, {pipeline_mode = #tpu.pipeline_mode<synchronous>, transform_indices = @transform_1, window_bounds = array<i64: 8, 16, 64>}, {pipeline_mode = #tpu.pipeline_mode<synchronous>, transform_indices = @transform_2, window_bounds = array<i64: 256, 128>}, {pipeline_mode = #tpu.pipeline_mode<synchronous>, transform_indices = @transform_3, window_bounds = array<i64: 256, 512>}, {pipeline_mode = #tpu.pipeline_mode<synchronous>, transform_indices = @transform_4, window_bounds = array<i64: 1, 512>}, {pipeline_mode = #tpu.pipeline_mode<synchronous>, transform_indices = @transform_5, window_bounds = array<i64: 128, 64>}, {pipeline_mode = #tpu.pipeline_mode<synchronous>, transform_indices = @transform_6, window_bounds = array<i64: 1, 64>}, {pipeline_mode = #tpu.pipeline_mode<synchronous>, transform_indices = @transform_7, window_bounds = array<i64: 192, 128>}, {pipeline_mode = #tpu.pipeline_mode<synchronous>, transform_indices = @transform_8, window_bounds = array<i64: 1, 128>}, {pipeline_mode = #tpu.pipeline_mode<synchronous>, transform_indices = @transform_9, window_bounds = array<i64: 128, 256>}, {pipeline_mode = #tpu.pipeline_mode<synchronous>, transform_indices = @transform_10, window_bounds = array<i64: 1, 256>}, {transform_indices = @transform_11, window_bounds = array<i64: 1, 8, 256>}]} {
    %c0_i32 = arith.constant 0 : i32
    %0 = arith.cmpi eq, %arg0, %c0_i32 : i32
    %1 = arith.extui %0 : i1 to i32
    %c0_i32_0 = arith.constant 0 : i32
    %2 = arith.cmpi ne, %1, %c0_i32_0 : i32
    scf.if %2 {
      %c0_44 = arith.constant 0 : index
      %c0_45 = arith.constant 0 : index
      %90 = vector.load %arg3[%c0_44, %c0_45] : memref<256x128xf32, #tpu.memory_space<vmem>>, vector<1x128xf32>
      %91 = vector.shape_cast %90 : vector<1x128xf32> to vector<1x128xf32>
      %92 = vector.broadcast %91 : vector<1x128xf32> to vector<8x128xf32>
      %c0_46 = arith.constant 0 : index
      %c0_47 = arith.constant 0 : index
      %93 = vector.load %arg13[%c0_46, %c0_47] : memref<8x256xf32, #tpu.memory_space<vmem>>, vector<8x128xf32>
      tpu.vector_store %arg13[%c0_46, %c0_47], %92 {strides = array<i32>} : memref<8x256xf32, #tpu.memory_space<vmem>>, vector<8x128xf32>,
      %c0_48 = arith.constant 0 : index
      %c0_49 = arith.constant 0 : index
      %94 = vector.load %arg1[%c0_48, %c0_49] : memref<8x128xf32, #tpu.memory_space<vmem>>, vector<8x128xf32>
      %c0_50 = arith.constant 0 : index
      %c128_51 = arith.constant 128 : index
      %95 = vector.load %arg13[%c0_50, %c128_51] : memref<8x256xf32, #tpu.memory_space<vmem>>, vector<8x128xf32>
      tpu.vector_store %arg13[%c0_50, %c128_51], %94 {strides = array<i32>} : memref<8x256xf32, #tpu.memory_space<vmem>>, vector<8x128xf32>,
    } else {
    }
    %c0 = arith.constant 0 : index
    %c0_1 = arith.constant 0 : index
    %3 = vector.load %arg13[%c0, %c0_1] : memref<8x256xf32, #tpu.memory_space<vmem>>, vector<8x256xf32>
    %4 = vector.extract_strided_slice %3 {offsets = [0, 128], sizes = [8, 128], strides = [1, 1]} : vector<8x256xf32> to vector<8x128xf32>
    %c0_2 = arith.constant 0 : index
    %c0_3 = arith.constant 0 : index
    %5 = vector.load %arg4[%c0_2, %c0_3] : memref<256x512xf32, #tpu.memory_space<vmem>>, vector<256x512xf32>
    %cst = arith.constant dense<0.000000e+00> : vector<8x512xf32>
    %6 = tpu.matmul %3, %5, %cst {dimension_numbers = #tpu.dot_dimension_numbers<[1], [0], [0], [1], [0, 0, 1, 1], [], []>} : vector<8x256xf32>, vector<256x512xf32>, vector<8x512xf32> -> vector<8x512xf32>
    %c0_4 = arith.constant 0 : index
    %c0_5 = arith.constant 0 : index
    %7 = vector.load %arg5[%c0_4, %c0_5] : memref<1x512xf32, #tpu.memory_space<vmem>>, vector<1x512xf32>
    %8 = vector.broadcast %7 : vector<1x512xf32> to vector<8x512xf32>
    %9 = arith.addf %6, %8 : vector<8x512xf32>
    %10 = vector.extract_strided_slice %9 {offsets = [0, 0], sizes = [8, 128], strides = [1, 1]} : vector<8x512xf32> to vector<8x128xf32>
    %11 = arith.negf %10 : vector<8x128xf32>
    %12 = math.exp %11 : vector<8x128xf32>
    %cst_6 = arith.constant 1.000000e+00 : f32
    %13 = vector.broadcast %cst_6 : f32 to vector<8x128xf32>
    %14 = arith.addf %13, %12 : vector<8x128xf32>
    %15 = arith.divf %13, %14 : vector<8x128xf32>
    %16 = vector.extract_strided_slice %9 {offsets = [0, 128], sizes = [8, 128], strides = [1, 1]} : vector<8x512xf32> to vector<8x128xf32>
    %17 = arith.negf %16 : vector<8x128xf32>
    %18 = math.exp %17 : vector<8x128xf32>
    %cst_7 = arith.constant 1.000000e+00 : f32
    %19 = vector.broadcast %cst_7 : f32 to vector<8x128xf32>
    %20 = arith.addf %19, %18 : vector<8x128xf32>
    %21 = arith.divf %19, %20 : vector<8x128xf32>
    %22 = vector.extract_strided_slice %9 {offsets = [0, 256], sizes = [8, 128], strides = [1, 1]} : vector<8x512xf32> to vector<8x128xf32>
    %23 = vector.extract_strided_slice %9 {offsets = [0, 384], sizes = [8, 128], strides = [1, 1]} : vector<8x512xf32> to vector<8x128xf32>
    %24 = arith.mulf %15, %23 : vector<8x128xf32>
    %25 = arith.addf %22, %24 : vector<8x128xf32>
    %26 = math.tanh %25 : vector<8x128xf32>
    %cst_8 = arith.constant 1.000000e+00 : f32
    %27 = vector.broadcast %cst_8 : f32 to vector<8x128xf32>
    %28 = arith.subf %27, %21 : vector<8x128xf32>
    %29 = arith.mulf %28, %26 : vector<8x128xf32>
    %30 = arith.mulf %21, %4 : vector<8x128xf32>
    %31 = arith.addf %29, %30 : vector<8x128xf32>
    %c0_9 = arith.constant 0 : index
    %c0_10 = arith.constant 0 : index
    %32 = vector.load %arg6[%c0_9, %c0_10] : memref<128x64xf32, #tpu.memory_space<vmem>>, vector<128x64xf32>
    %cst_11 = arith.constant dense<0.000000e+00> : vector<8x64xf32>
    %33 = tpu.matmul %31, %32, %cst_11 {dimension_numbers = #tpu.dot_dimension_numbers<[1], [0], [0], [1], [0, 0, 1, 1], [], []>} : vector<8x128xf32>, vector<128x64xf32>, vector<8x64xf32> -> vector<8x64xf32>
    %c0_12 = arith.constant 0 : index
    %c0_13 = arith.constant 0 : index
    %34 = vector.load %arg7[%c0_12, %c0_13] : memref<1x64xf32, #tpu.memory_space<vmem>>, vector<1x64xf32>
    %35 = vector.broadcast %34 : vector<1x64xf32> to vector<8x64xf32>
    %36 = arith.addf %33, %35 : vector<8x64xf32>
    %c0_14 = arith.constant 0 : index
    %c0_15 = arith.constant 0 : index
    %c0_16 = arith.constant 0 : index
    %37 = vector.load %arg2[%c0_14, %c0_15, %c0_16] : memref<8x16x64xf32, #tpu.memory_space<vmem>>, vector<8x16x64xf32>
    %38 = vector.shape_cast %36 : vector<8x64xf32> to vector<8x1x64xf32>
    %39 = vector.broadcast %38 : vector<8x1x64xf32> to vector<8x16x64xf32>
    %40 = arith.mulf %39, %37 : vector<8x16x64xf32>
    %cst_17 = arith.constant dense<0.000000e+00> : vector<8x16xf32>
    %41 = vector.multi_reduction <add>, %40, %cst_17 [2] : vector<8x16x64xf32> to vector<8x16xf32>
    %42 = vector.shape_cast %41 : vector<8x16xf32> to vector<8x16x1xf32>
    %cst_18 = arith.constant dense<0xFF800000> : vector<8x1xf32>
    %43 = vector.multi_reduction <maximumf>, %42, %cst_18 [1] : vector<8x16x1xf32> to vector<8x1xf32>
    %44 = vector.shape_cast %43 : vector<8x1xf32> to vector<8x1x1xf32>
    %45 = vector.broadcast %44 : vector<8x1x1xf32> to vector<8x16x1xf32>
    %46 = arith.subf %42, %45 : vector<8x16x1xf32>
    %47 = math.exp %46 : vector<8x16x1xf32>
    %cst_19 = arith.constant dense<0.000000e+00> : vector<8x1xf32>
    %48 = vector.multi_reduction <add>, %47, %cst_19 [1] : vector<8x16x1xf32> to vector<8x1xf32>
    %49 = vector.shape_cast %48 : vector<8x1xf32> to vector<8x1x1xf32>
    %50 = tpu.reciprocal %49 {approx = true} : vector<8x1x1xf32> -> vector<8x1x1xf32>
    %51 = vector.broadcast %50 : vector<8x1x1xf32> to vector<8x16x1xf32>
    %52 = arith.mulf %47, %51 : vector<8x16x1xf32>
    %53 = vector.broadcast %52 : vector<8x16x1xf32> to vector<8x16x64xf32>
    %54 = arith.mulf %53, %37 : vector<8x16x64xf32>
    %cst_20 = arith.constant dense<0.000000e+00> : vector<8x64xf32>
    %55 = vector.multi_reduction <add>, %54, %cst_20 [1] : vector<8x16x64xf32> to vector<8x64xf32>
    %56 = tpu.concatenate %31, %55 in 1 : vector<8x128xf32>, vector<8x64xf32> -> vector<8x192xf32>
    %c0_21 = arith.constant 0 : index
    %c0_22 = arith.constant 0 : index
    %57 = vector.load %arg8[%c0_21, %c0_22] : memref<192x128xf32, #tpu.memory_space<vmem>>, vector<192x128xf32>
    %cst_23 = arith.constant dense<0.000000e+00> : vector<8x128xf32>
    %58 = tpu.matmul %56, %57, %cst_23 {dimension_numbers = #tpu.dot_dimension_numbers<[1], [0], [0], [1], [0, 0, 1, 1], [], []>} : vector<8x192xf32>, vector<192x128xf32>, vector<8x128xf32> -> vector<8x128xf32>
    %c0_24 = arith.constant 0 : index
    %c0_25 = arith.constant 0 : index
    %59 = vector.load %arg9[%c0_24, %c0_25] : memref<1x128xf32, #tpu.memory_space<vmem>>, vector<1x128xf32>
    %60 = vector.broadcast %59 : vector<1x128xf32> to vector<8x128xf32>
    %61 = arith.addf %58, %60 : vector<8x128xf32>
    %cst_26 = arith.constant 0.000000e+00 : f32
    %62 = vector.broadcast %cst_26 : f32 to vector<8x128xf32>
    %63 = arith.maximumf %61, %62 : vector<8x128xf32>
    %c0_27 = arith.constant 0 : index
    %c0_28 = arith.constant 0 : index
    %64 = vector.load %arg10[%c0_27, %c0_28] : memref<128x256xf32, #tpu.memory_space<vmem>>, vector<128x256xf32>
    %cst_29 = arith.constant dense<0.000000e+00> : vector<8x256xf32>
    %65 = tpu.matmul %63, %64, %cst_29 {dimension_numbers = #tpu.dot_dimension_numbers<[1], [0], [0], [1], [0, 0, 1, 1], [], []>} : vector<8x128xf32>, vector<128x256xf32>, vector<8x256xf32> -> vector<8x256xf32>
    %c0_30 = arith.constant 0 : index
    %c0_31 = arith.constant 0 : index
    %66 = vector.load %arg11[%c0_30, %c0_31] : memref<1x256xf32, #tpu.memory_space<vmem>>, vector<1x256xf32>
    %67 = vector.broadcast %66 : vector<1x256xf32> to vector<8x256xf32>
    %68 = arith.addf %65, %67 : vector<8x256xf32>
    %c0_32 = arith.constant 0 : index
    %c0_33 = arith.constant 0 : index
    %c0_34 = arith.constant 0 : index
    %69 = vector.load %arg12[%c0_32, %c0_33, %c0_34] : memref<1x8x256xf32, #tpu.memory_space<vmem>>, vector<1x8x256xf32>
    %70 = vector.shape_cast %69 : vector<1x8x256xf32> to vector<8x256xf32>
    %71 = vector.shape_cast %68 : vector<8x256xf32> to vector<1x8x256xf32>
    tpu.vector_store %arg12[%c0_32, %c0_33, %c0_34], %71 {strides = array<i32>} : memref<1x8x256xf32, #tpu.memory_space<vmem>>, vector<1x8x256xf32>,
    %72 = tpu.iota {dimensions = array<i32: 1>} : vector<8x256xi32>
    %73 = arith.sitofp %72 : vector<8x256xi32> to vector<8x256xf32>
    %cst_35 = arith.constant dense<0xFF800000> : vector<8xf32>
    %74 = vector.multi_reduction <maximumf>, %68, %cst_35 [1] : vector<8x256xf32> to vector<8xf32>
    %75 = vector.shape_cast %74 : vector<8xf32> to vector<8x1xf32>
    %76 = vector.broadcast %75 : vector<8x1xf32> to vector<8x256xf32>
    %77 = arith.cmpf oeq, %68, %76 : vector<8x256xf32>
    %cst_36 = arith.constant 2.560000e+02 : f32
    %78 = vector.broadcast %cst_36 : f32 to vector<8x256xf32>
    %79 = arith.select %77, %73, %78 : vector<8x256xi1>, vector<8x256xf32>
    %cst_37 = arith.constant dense<0x7F800000> : vector<8xf32>
    %80 = vector.multi_reduction <minimumf>, %79, %cst_37 [1] : vector<8x256xf32> to vector<8xf32>
    %81 = vector.shape_cast %80 : vector<8xf32> to vector<8x1xf32>
    %82 = vector.broadcast %81 : vector<8x1xf32> to vector<8x256xf32>
    %83 = arith.cmpf oeq, %73, %82 : vector<8x256xf32>
    %84 = arith.extui %83 : vector<8x256xi1> to vector<8x256xi32>
    %85 = arith.sitofp %84 : vector<8x256xi32> to vector<8x256xf32>
    %c0_38 = arith.constant 0 : index
    %c0_39 = arith.constant 0 : index
    %86 = vector.load %arg3[%c0_38, %c0_39] : memref<256x128xf32, #tpu.memory_space<vmem>>, vector<256x128xf32>
    %cst_40 = arith.constant dense<0.000000e+00> : vector<8x128xf32>
    %87 = tpu.matmul %85, %86, %cst_40 {dimension_numbers = #tpu.dot_dimension_numbers<[1], [0], [0], [1], [0, 0, 1, 1], [], []>} : vector<8x256xf32>, vector<256x128xf32>, vector<8x128xf32> -> vector<8x128xf32>
    %c0_41 = arith.constant 0 : index
    %c0_42 = arith.constant 0 : index
    %88 = vector.load %arg13[%c0_41, %c0_42] : memref<8x256xf32, #tpu.memory_space<vmem>>, vector<8x128xf32>
    tpu.vector_store %arg13[%c0_41, %c0_42], %87 {strides = array<i32>} : memref<8x256xf32, #tpu.memory_space<vmem>>, vector<8x128xf32>,
    %c0_43 = arith.constant 0 : index
    %c128 = arith.constant 128 : index
    %89 = vector.load %arg13[%c0_43, %c128] : memref<8x256xf32, #tpu.memory_space<vmem>>, vector<8x128xf32>
    tpu.vector_store %arg13[%c0_43, %c128], %31 {strides = array<i32>} : memref<8x256xf32, #tpu.memory_space<vmem>>, vector<8x128xf32>,
    return
  }
  func.func @transform_0(%arg0: i32) -> (i32, i32) {
    %c0_i32 = arith.constant 0 : i32
    %c0_i32_0 = arith.constant 0 : i32
    %c0_i32_1 = arith.constant 0 : i32
    return %c0_i32, %c0_i32_0 : i32, i32
  }
  func.func @transform_1(%arg0: i32) -> (i32, i32, i32) {
    %c0_i32 = arith.constant 0 : i32
    %c0_i32_0 = arith.constant 0 : i32
    %c0_i32_1 = arith.constant 0 : i32
    %c0_i32_2 = arith.constant 0 : i32
    return %c0_i32, %c0_i32_0, %c0_i32_1 : i32, i32, i32
  }
  func.func @transform_2(%arg0: i32) -> (i32, i32) {
    %c0_i32 = arith.constant 0 : i32
    %c0_i32_0 = arith.constant 0 : i32
    %c0_i32_1 = arith.constant 0 : i32
    return %c0_i32, %c0_i32_0 : i32, i32
  }
  func.func @transform_3(%arg0: i32) -> (i32, i32) {
    %c0_i32 = arith.constant 0 : i32
    %c0_i32_0 = arith.constant 0 : i32
    %c0_i32_1 = arith.constant 0 : i32
    return %c0_i32, %c0_i32_0 : i32, i32
  }
  func.func @transform_4(%arg0: i32) -> (i32, i32) {
    %c0_i32 = arith.constant 0 : i32
    %c0_i32_0 = arith.constant 0 : i32
    %c0_i32_1 = arith.constant 0 : i32
    return %c0_i32, %c0_i32_0 : i32, i32
  }
  func.func @transform_5(%arg0: i32) -> (i32, i32) {
    %c0_i32 = arith.constant 0 : i32
    %c0_i32_0 = arith.constant 0 : i32
    %c0_i32_1 = arith.constant 0 : i32
    return %c0_i32, %c0_i32_0 : i32, i32
  }
  func.func @transform_6(%arg0: i32) -> (i32, i32) {
    %c0_i32 = arith.constant 0 : i32
    %c0_i32_0 = arith.constant 0 : i32
    %c0_i32_1 = arith.constant 0 : i32
    return %c0_i32, %c0_i32_0 : i32, i32
  }
  func.func @transform_7(%arg0: i32) -> (i32, i32) {
    %c0_i32 = arith.constant 0 : i32
    %c0_i32_0 = arith.constant 0 : i32
    %c0_i32_1 = arith.constant 0 : i32
    return %c0_i32, %c0_i32_0 : i32, i32
  }
  func.func @transform_8(%arg0: i32) -> (i32, i32) {
    %c0_i32 = arith.constant 0 : i32
    %c0_i32_0 = arith.constant 0 : i32
    %c0_i32_1 = arith.constant 0 : i32
    return %c0_i32, %c0_i32_0 : i32, i32
  }
  func.func @transform_9(%arg0: i32) -> (i32, i32) {
    %c0_i32 = arith.constant 0 : i32
    %c0_i32_0 = arith.constant 0 : i32
    %c0_i32_1 = arith.constant 0 : i32
    return %c0_i32, %c0_i32_0 : i32, i32
  }
  func.func @transform_10(%arg0: i32) -> (i32, i32) {
    %c0_i32 = arith.constant 0 : i32
    %c0_i32_0 = arith.constant 0 : i32
    %c0_i32_1 = arith.constant 0 : i32
    return %c0_i32, %c0_i32_0 : i32, i32
  }
  func.func @transform_11(%arg0: i32) -> (i32, i32, i32) {
    %c0_i32 = arith.constant 0 : i32
    %c0_i32_0 = arith.constant 0 : i32
    %c0_i32_1 = arith.constant 0 : i32
    return %arg0, %c0_i32, %c0_i32_0 : i32, i32, i32
  }
}

</mosaic_0001>

<bundles_post_ra>
// kernel: decoder_forward.1
= control target key start
LH: loop header
LB: loop body
LE: loop exit
PB: predicated region body
PF: predicated region fallthrough
CT: control target
= control target key end

     0   :  { %s1889_s17 = smov 0   ;;  %s2960_s0 = inlined_call_operand.vmem [shape: f32[8,128], index: 0, kind: input, shape index: {}]   ;;  %s2961_s1 = inlined_call_operand.vmem [shape: f32[8,16,64], index: 1, kind: input, shape index: {}]   ;;  %s2962_s2 = inlined_call_operand.vmem [shape: f32[256,128], index: 2, kind: input, shape index: {}]   ;;  %s2963_s3 = inlined_call_operand.vmem [shape: f32[256,512], index: 3, kind: input, shape index: {}]   ;;  %s2964_s4 = inlined_call_operand.vmem [shape: f32[1,512], index: 4, kind: input, shape index: {}]   ;;  %s2965_s5 = inlined_call_operand.vmem [shape: f32[128,64], index: 5, kind: input, shape index: {}]   ;;  %s2966_s6 = inlined_call_operand.vmem [shape: f32[1,64], index: 6, kind: input, shape index: {}]   ;;  %s2967_s7 = inlined_call_operand.vmem [shape: f32[192,128], index: 7, kind: input, shape index: {}]   ;;  %s2968_s8 = inlined_call_operand.vmem [shape: f32[1,128], index: 8, kind: input, shape index: {}]   ;;  %s2969_s9 = inlined_call_operand.vmem [shape: f32[128,256], index: 9, kind: input, shape index: {}]   ;;  %s2970_s10 = inlined_call_operand.vmem [shape: f32[1,256], index: 10, kind: input, shape index: {}]   ;;  %s2971_s11 = inlined_call_operand.vmem [shape: f32[8,8,256], index: 11, kind: output, shape index: {}]  }
   0x1 LB: > { %s1639_s18 = sadd.s32 4294967295, %s1823_s17   ;;  %p1642_p0 = scmp.ge.s32.totalorder %s1823_s17, 1  ;;  %s1823_s17 = sphi %s1889_s17, %s21_s17  }
   0x2   : > { %p327_p1 = scmp.lt.s32.totalorder %s1823_s17, 9 }
   0x4   : > { %p328_p2 = pnand %p1642_p0, %p327_p1 }
   0x5   : > { %p362_p3 = scmp.lt.s32.totalorder (!%p328_p2), %s1639_s18, 7  ;;  %p1645_p4 = scmp.ne.s32.totalorder (!%p328_p2), %s1639_s18, 0 }
   0x6   : > { %331 = sbr.rel (%p328_p2) target bundleno = 1668 (0x684), region = 64 }
   0xb   : > { %s363_s19 = scalar_select %p362_p3, %s1639_s18, 7 }
   0xc   : > { %370 = sbr.rel (%p1645_p4) target bundleno = 20 (0x14), region = 68 }
   0xd   : > { %s1658_s20 = sshll.u32 %s363_s19, 4 }
   0xe   : > { %s1900_s23 = scalar_lea.vmem %s2971_s11, %s1658_s20 }
  0x11   : > { %v1646_v0 = vld [vmem:[%s2962_s2] ss:$0 sm:$0xff] }
  0x12   : > { %v377_v1 = vld [vmem:[%s2960_s0] sm:$0xff]  ;;  %376 = vst [vmem:[#allocation2] sm:$0xff] %v1646_v0 }
  0x13   : > { %378 = vst [vmem:[#allocation2 + $0x8] sm:$0xff] %v377_v1 }
  0x14 PF: > { %v442_v2 = vld [vmem:[%s2963_s3 + $0x1e8] sm:$0xff]  ;;  %v441_v3 = vld [vmem:[%s2963_s3 + $0x1e0] sm:$0xff]  ;;  %v444_v14 = vld [vmem:[%s2963_s3 + $0x1f8] sm:$0xff]  ;;  %vm1826_vm0 = vmmov 0   ;;  %vm907_vm1 = vcmask 523264   ;;  %vm1236_vm2 = vcmask 1041409  }
  0x15   : > { %v438_v4 = vld [vmem:[%s2963_s3 + $0x1c8] sm:$0xff]  ;;  %531 = vmatprep.subr.mxu0 %v442_v2  ;;  %v437_v5 = vld [vmem:[%s2963_s3 + $0x1c0] sm:$0xff]  ;;  %602 = vmatprep.subr.mxu1 %v444_v14  ;;  %v443_v16 = vld [vmem:[%s2963_s3 + $0x1f0] sm:$0xff]  ;;  %vm1238_vm3 = vcmask 1042434   ;;  %vm1240_vm4 = vcmask 1043459   ;;  %vm1242_vm5 = vcmask 1044484  }
  0x16   : > { %532 = vmatpush1.msra.mxu0 %v441_v3  ;;  %v434_v6 = vld [vmem:[%s2963_s3 + $0x1a8] sm:$0xff]  ;;  %v433_v7 = vld [vmem:[%s2963_s3 + $0x1a0] sm:$0xff]  ;;  %603 = vmatpush1.msra.mxu1 %v443_v16  ;;  %v440_v18 = vld [vmem:[%s2963_s3 + $0x1d8] sm:$0xff]  ;;  %vm1244_vm6 = vcmask 1045509   ;;  %vm1246_vm7 = vcmask 1046534   ;;  %vm1248_vm8 = vcmask 1047559  }
  0x17   : > { %533 = vmatprep.subr.mxu0 %v438_v4  ;;  %v430_v8 = vld [vmem:[%s2963_s3 + $0x188] sm:$0xff]  ;;  %v429_v9 = vld [vmem:[%s2963_s3 + $0x180] sm:$0xff]  ;;  %v439_v19 = vld [vmem:[%s2963_s3 + $0x1d0] sm:$0xff]  ;;  %604 = vmatprep.subr.mxu1 %v440_v18 }
  0x18   : > { %534 = vmatpush1.msra.mxu0 %v437_v5  ;;  %v426_v10 = vld [vmem:[%s2963_s3 + $0x168] sm:$0xff]  ;;  %v425_v11 = vld [vmem:[%s2963_s3 + $0x160] sm:$0xff]  ;;  %v436_v21 = vld [vmem:[%s2963_s3 + $0x1b8] sm:$0xff]  ;;  %605 = vmatpush1.msra.mxu1 %v439_v19 }
  0x19   : > { %535 = vmatprep.subr.mxu0 %v434_v6  ;;  %v422_v12 = vld [vmem:[%s2963_s3 + $0x148] sm:$0xff]  ;;  %v421_v13 = vld [vmem:[%s2963_s3 + $0x140] sm:$0xff]  ;;  %v435_v23 = vld [vmem:[%s2963_s3 + $0x1b0] sm:$0xff]  ;;  %606 = vmatprep.subr.mxu1 %v436_v21 }
  0x1a   : > { %536 = vmatpush1.msra.mxu0 %v433_v7  ;;  %v418_v15 = vld [vmem:[%s2963_s3 + $0x128] sm:$0xff]  ;;  %v417_v17 = vld [vmem:[%s2963_s3 + $0x120] sm:$0xff]  ;;  %v432_v24 = vld [vmem:[%s2963_s3 + $0x198] sm:$0xff]  ;;  %607 = vmatpush1.msra.mxu1 %v435_v23 }
  0x1b   : > { %537 = vmatprep.subr.mxu0 %v430_v8  ;;  %v414_v20 = vld [vmem:[%s2963_s3 + $0x108] sm:$0xff]  ;;  %v413_v22 = vld [vmem:[%s2963_s3 + $0x100] sm:$0xff]  ;;  %v431_v26 = vld [vmem:[%s2963_s3 + $0x190] sm:$0xff]  ;;  %608 = vmatprep.subr.mxu1 %v432_v24 }
  0x1c   : > { %538 = vmatpush1.msra.mxu0 %v429_v9  ;;  %v410_v25 = vld [vmem:[%s2963_s3 + $0xe8] sm:$0xff]  ;;  %v409_v27 = vld [vmem:[%s2963_s3 + $0xe0] sm:$0xff]  ;;  %v428_v28 = vld [vmem:[%s2963_s3 + $0x178] sm:$0xff]  ;;  %609 = vmatpush1.msra.mxu1 %v431_v26 }
  0x1d   : > { %539 = vmatprep.subr.mxu0 %v426_v10  ;;  %v406_v29 = vld [vmem:[%s2963_s3 + $0xc8] sm:$0xff]  ;;  %v427_v30 = vld [vmem:[%s2963_s3 + $0x170] sm:$0xff]  ;;  %v405_v31 = vld [vmem:[%s2963_s3 + $0xc0] sm:$0xff]  ;;  %610 = vmatprep.subr.mxu1 %v428_v28 }
  0x1e   : > { %540 = vmatpush1.msra.mxu0 %v425_v11  ;;  %v424_v32 = vld [vmem:[%s2963_s3 + $0x158] sm:$0xff]  ;;  %v402_v33 = vld [vmem:[%s2963_s3 + $0xa8] sm:$0xff]  ;;  %v423_v34 = vld [vmem:[%s2963_s3 + $0x150] sm:$0xff]  ;;  %611 = vmatpush1.msra.mxu1 %v427_v30 }
  0x1f   : > { %541 = vmatprep.subr.mxu0 %v422_v12  ;;  %v401_v35 = vld [vmem:[%s2963_s3 + $0xa0] sm:$0xff]  ;;  %v420_v36 = vld [vmem:[%s2963_s3 + $0x138] sm:$0xff]  ;;  %v398_v37 = vld [vmem:[%s2963_s3 + $0x88] sm:$0xff]  ;;  %612 = vmatprep.subr.mxu1 %v424_v32 }
  0x20   : > { %542 = vmatpush1.msra.mxu0 %v421_v13  ;;  %v419_v38 = vld [vmem:[%s2963_s3 + $0x130] sm:$0xff]  ;;  %v397_v39 = vld [vmem:[%s2963_s3 + $0x80] sm:$0xff]  ;;  %613 = vmatpush1.msra.mxu1 %v423_v34  ;;  %v416_v40 = vld [vmem:[%s2963_s3 + $0x118] sm:$0xff] }
  0x21   : > { %543 = vmatprep.subr.mxu0 %v418_v15  ;;  %v394_v41 = vld [vmem:[%s2963_s3 + $0x68] sm:$0xff]  ;;  %614 = vmatprep.subr.mxu1 %v420_v36  ;;  %v415_v42 = vld [vmem:[%s2963_s3 + $0x110] sm:$0xff]  ;;  %v393_v43 = vld [vmem:[%s2963_s3 + $0x60] sm:$0xff] }
  0x22   : > { %544 = vmatpush1.msra.mxu0 %v417_v17  ;;  %615 = vmatpush1.msra.mxu1 %v419_v38  ;;  %v412_v44 = vld [vmem:[%s2963_s3 + $0xf8] sm:$0xff]  ;;  %v390_v45 = vld [vmem:[%s2963_s3 + $0x48] sm:$0xff]  ;;  %v411_v46 = vld [vmem:[%s2963_s3 + $0xf0] sm:$0xff] }
  0x23   : > { %545 = vmatprep.subr.mxu0 %v414_v20  ;;  %616 = vmatprep.subr.mxu1 %v416_v40  ;;  %v389_v47 = vld [vmem:[%s2963_s3 + $0x40] sm:$0xff]  ;;  %v408_v48 = vld [vmem:[%s2963_s3 + $0xd8] sm:$0xff]  ;;  %v386_v49 = vld [vmem:[%s2963_s3 + $0x28] sm:$0xff] }
  0x24   : > { %546 = vmatpush1.msra.mxu0 %v413_v22  ;;  %617 = vmatpush1.msra.mxu1 %v415_v42  ;;  %v407_v50 = vld [vmem:[%s2963_s3 + $0xd0] sm:$0xff]  ;;  %v385_v51 = vld [vmem:[%s2963_s3 + $0x20] sm:$0xff]  ;;  %v404_v52 = vld [vmem:[%s2963_s3 + $0xb8] sm:$0xff] }
  0x25   : > { %547 = vmatprep.subr.mxu0 %v410_v25  ;;  %618 = vmatprep.subr.mxu1 %v412_v44  ;;  %v382_v53 = vld [vmem:[%s2963_s3 + $0x8] sm:$0xff]  ;;  %v403_v54 = vld [vmem:[%s2963_s3 + $0xb0] sm:$0xff]  ;;  %v381_v55 = vld [vmem:[%s2963_s3] sm:$0xff] }
  0x26   : > { %548 = vmatpush1.msra.mxu0 %v409_v27  ;;  %619 = vmatpush1.msra.mxu1 %v411_v46  ;;  %v400_v56 = vld [vmem:[%s2963_s3 + $0x98] sm:$0xff]  ;;  %v506_v57 = vld [vmem:[%s2963_s3 + $0x3e8] sm:$0xff]  ;;  %v399_v58 = vld [vmem:[%s2963_s3 + $0x90] sm:$0xff] }
  0x27   : > { %549 = vmatprep.subr.mxu0 %v406_v29  ;;  %620 = vmatprep.subr.mxu1 %v408_v48  ;;  %v505_v59 = vld [vmem:[%s2963_s3 + $0x3e0] sm:$0xff]  ;;  %v396_v60 = vld [vmem:[%s2963_s3 + $0x78] sm:$0xff]  ;;  %v502_v61 = vld [vmem:[%s2963_s3 + $0x3c8] sm:$0xff] }
  0x28   : > { %550 = vmatpush1.msra.mxu0 %v405_v31  ;;  %621 = vmatpush1.msra.mxu1 %v407_v50  ;;  %v395_v62 = vld [vmem:[%s2963_s3 + $0x70] sm:$0xff]  ;;  %v501_v63 = vld [vmem:[%s2963_s3 + $0x3c0] sm:$0xff]  ;;  %v392_v0 = vld [vmem:[%s2963_s3 + $0x58] sm:$0xff] }
  0x29   : > { %551 = vmatprep.subr.mxu0 %v402_v33  ;;  %622 = vmatprep.subr.mxu1 %v404_v52  ;;  %v498_v1 = vld [vmem:[%s2963_s3 + $0x3a8] sm:$0xff]  ;;  %v391_v2 = vld [vmem:[%s2963_s3 + $0x50] sm:$0xff]  ;;  %v497_v3 = vld [vmem:[%s2963_s3 + $0x3a0] sm:$0xff] }
  0x2a   : > { %552 = vmatpush1.msra.mxu0 %v401_v35  ;;  %623 = vmatpush1.msra.mxu1 %v403_v54  ;;  %v388_v4 = vld [vmem:[%s2963_s3 + $0x38] sm:$0xff]  ;;  %v494_v5 = vld [vmem:[%s2963_s3 + $0x388] sm:$0xff]  ;;  %v387_v6 = vld [vmem:[%s2963_s3 + $0x30] sm:$0xff] }
  0x2b   : > { %553 = vmatprep.subr.mxu0 %v398_v37  ;;  %624 = vmatprep.subr.mxu1 %v400_v56  ;;  %v493_v7 = vld [vmem:[%s2963_s3 + $0x380] sm:$0xff]  ;;  %v384_v8 = vld [vmem:[%s2963_s3 + $0x18] sm:$0xff]  ;;  %v490_v9 = vld [vmem:[%s2963_s3 + $0x368] sm:$0xff] }
  0x2c   : > { %554 = vmatpush1.msra.mxu0 %v397_v39  ;;  %625 = vmatpush1.msra.mxu1 %v399_v58  ;;  %v383_v10 = vld [vmem:[%s2963_s3 + $0x10] sm:$0xff]  ;;  %v489_v11 = vld [vmem:[%s2963_s3 + $0x360] sm:$0xff]  ;;  %v508_v12 = vld [vmem:[%s2963_s3 + $0x3f8] sm:$0xff] }
  0x2d   : > { %555 = vmatprep.subr.mxu0 %v394_v41  ;;  %626 = vmatprep.subr.mxu1 %v396_v60  ;;  %v486_v13 = vld [vmem:[%s2963_s3 + $0x348] sm:$0xff]  ;;  %v507_v14 = vld [vmem:[%s2963_s3 + $0x3f0] sm:$0xff]  ;;  %v485_v15 = vld [vmem:[%s2963_s3 + $0x340] sm:$0xff] }
  0x2e   : > { %556 = vmatpush1.msra.mxu0 %v393_v43  ;;  %627 = vmatpush1.msra.mxu1 %v395_v62  ;;  %v504_v16 = vld [vmem:[%s2963_s3 + $0x3d8] sm:$0xff]  ;;  %v482_v17 = vld [vmem:[%s2963_s3 + $0x328] sm:$0xff]  ;;  %v481_v19 = vld [vmem:[%s2963_s3 + $0x320] sm:$0xff] }
  0x2f   : > { %557 = vmatprep.subr.mxu0 %v390_v45  ;;  %628 = vmatprep.subr.mxu1 %v392_v0  ;;  %v2148_v18 = vld [vmem:[#allocation2 + $0x8] sm:$0xff]  ;;  %v503_v20 = vld [vmem:[%s2963_s3 + $0x3d0] sm:$0xff]  ;;  %v500_v22 = vld [vmem:[%s2963_s3 + $0x3b8] sm:$0xff] }
  0x30   : > { %558 = vmatpush1.msra.mxu0 %v389_v47  ;;  %629 = vmatpush1.msra.mxu1 %v391_v2  ;;  %v478_v21 = vld [vmem:[%s2963_s3 + $0x308] sm:$0xff]  ;;  %v477_v23 = vld [vmem:[%s2963_s3 + $0x300] sm:$0xff]  ;;  %v499_v24 = vld [vmem:[%s2963_s3 + $0x3b0] sm:$0xff] }
  0x31   : > { %559 = vmatprep.subr.mxu0 %v386_v49  ;;  %630 = vmatprep.subr.mxu1 %v388_v4  ;;  %v474_v25 = vld [vmem:[%s2963_s3 + $0x2e8] sm:$0xff]  ;;  %v496_v26 = vld [vmem:[%s2963_s3 + $0x398] sm:$0xff]  ;;  %v473_v27 = vld [vmem:[%s2963_s3 + $0x2e0] sm:$0xff] }
  0x32   : > { %560 = vmatpush1.msra.mxu0 %v385_v51  ;;  %631 = vmatpush1.msra.mxu1 %v387_v6  ;;  %v495_v28 = vld [vmem:[%s2963_s3 + $0x390] sm:$0xff]  ;;  %v470_v29 = vld [vmem:[%s2963_s3 + $0x2c8] sm:$0xff]  ;;  %v492_v30 = vld [vmem:[%s2963_s3 + $0x378] sm:$0xff] }
  0x33   : > { %561 = vmatprep.subr.mxu0 %v382_v53  ;;  %632 = vmatprep.subr.mxu1 %v384_v8  ;;  %v469_v31 = vld [vmem:[%s2963_s3 + $0x2c0] sm:$0xff]  ;;  %v491_v32 = vld [vmem:[%s2963_s3 + $0x370] sm:$0xff]  ;;  %v466_v33 = vld [vmem:[%s2963_s3 + $0x2a8] sm:$0xff] }
  0x34   : > { %562 = vmatpush1.msra.mxu0 %v381_v55  ;;  %633 = vmatpush1.msra.mxu1 %v383_v10  ;;  %v488_v34 = vld [vmem:[%s2963_s3 + $0x358] sm:$0xff]  ;;  %v465_v35 = vld [vmem:[%s2963_s3 + $0x2a0] sm:$0xff]  ;;  %v487_v36 = vld [vmem:[%s2963_s3 + $0x350] sm:$0xff] }
  0x35   : > { %563 = vmatprep.subr.mxu0 %v506_v57  ;;  %634 = vmatprep.subr.mxu1 %v508_v12  ;;  %v462_v37 = vld [vmem:[%s2963_s3 + $0x288] sm:$0xff]  ;;  %v484_v38 = vld [vmem:[%s2963_s3 + $0x338] sm:$0xff]  ;;  %v461_v39 = vld [vmem:[%s2963_s3 + $0x280] sm:$0xff] }
  0x36   : > { %564 = vmatpush2.msra.mxu0 %v505_v59  ;;  %635 = vmatpush2.msra.mxu1 %v507_v14  ;;  %v483_v40 = vld [vmem:[%s2963_s3 + $0x330] sm:$0xff]  ;;  %v458_v41 = vld [vmem:[%s2963_s3 + $0x268] sm:$0xff]  ;;  %v480_v42 = vld [vmem:[%s2963_s3 + $0x318] sm:$0xff] }
  0x37   : > { %565 = vmatprep.subr.mxu0 %v502_v61  ;;  %636 = vmatprep.subr.mxu1 %v504_v16  ;;  %v457_v43 = vld [vmem:[%s2963_s3 + $0x260] sm:$0xff]  ;;  %v479_v44 = vld [vmem:[%s2963_s3 + $0x310] sm:$0xff]  ;;  %v454_v45 = vld [vmem:[%s2963_s3 + $0x248] sm:$0xff] }
  0x38   : > { %566 = vmatpush2.msra.mxu0 %v501_v63  ;;  %595 = vmatprep.mubr.f32.mxu0 %v2148_v18  ;;  %v476_v46 = vld [vmem:[%s2963_s3 + $0x2f8] sm:$0xff]  ;;  %v453_v47 = vld [vmem:[%s2963_s3 + $0x240] sm:$0xff]  ;;  %v475_v48 = vld [vmem:[%s2963_s3 + $0x2f0] sm:$0xff] }
  0x39   : > { %567 = vmatprep.subr.mxu0 %v498_v1  ;;  %637 = vmatpush2.msra.mxu1 %v503_v20  ;;  %v450_v49 = vld [vmem:[%s2963_s3 + $0x228] sm:$0xff]  ;;  %v472_v50 = vld [vmem:[%s2963_s3 + $0x2d8] sm:$0xff]  ;;  %v449_v51 = vld [vmem:[%s2963_s3 + $0x220] sm:$0xff] }
  0x3a   : > { %568 = vmatpush2.msra.mxu0 %v497_v3  ;;  %638 = vmatprep.subr.mxu1 %v500_v22  ;;  %v471_v52 = vld [vmem:[%s2963_s3 + $0x2d0] sm:$0xff]  ;;  %v446_v53 = vld [vmem:[%s2963_s3 + $0x208] sm:$0xff]  ;;  %v468_v54 = vld [vmem:[%s2963_s3 + $0x2b8] sm:$0xff]  ;;  %v511_v22 = vlaneseq }
  0x3b   : > { %569 = vmatprep.subr.mxu0 %v494_v5  ;;  %639 = vmatpush2.msra.mxu1 %v499_v24  ;;  %v445_v55 = vld [vmem:[%s2963_s3 + $0x200] sm:$0xff]  ;;  %v467_v56 = vld [vmem:[%s2963_s3 + $0x2b0] sm:$0xff]  ;;  %v464_v58 = vld [vmem:[%s2963_s3 + $0x298] sm:$0xff]  ;;  %v1825_v5 = vmov 0.0  }
  0x3c   : > { %570 = vmatpush2.msra.mxu0 %v493_v7  ;;  %640 = vmatprep.subr.mxu1 %v496_v26  ;;  %v379_v57 = vld [vmem:[#allocation2] sm:$0xff]  ;;  %v463_v59 = vld [vmem:[%s2963_s3 + $0x290] sm:$0xff]  ;;  %v460_v60 = vld [vmem:[%s2963_s3 + $0x278] sm:$0xff] }
  0x3d   : > { %571 = vmatprep.subr.mxu0 %v490_v9  ;;  %641 = vmatpush2.msra.mxu1 %v495_v28  ;;  %v459_v61 = vld [vmem:[%s2963_s3 + $0x270] sm:$0xff]  ;;  %v456_v62 = vld [vmem:[%s2963_s3 + $0x258] sm:$0xff]  ;;  %v705_v7 = vld [vmem:[%s2965_s5 + $0x68] sm:$0xff] }
  0x3e   : > { %572 = vmatpush2.msra.mxu0 %v489_v11  ;;  %642 = vmatprep.subr.mxu1 %v492_v30  ;;  %v455_v63 = vld [vmem:[%s2963_s3 + $0x250] sm:$0xff]  ;;  %v452_v0 = vld [vmem:[%s2963_s3 + $0x238] sm:$0xff]  ;;  %v704_v8 = vld [vmem:[%s2965_s5 + $0x60] sm:$0xff] }
  0x3f   : > { %573 = vmatprep.subr.mxu0 %v486_v13  ;;  %643 = vmatpush2.msra.mxu1 %v491_v32  ;;  %v451_v1 = vld [vmem:[%s2963_s3 + $0x230] sm:$0xff]  ;;  %v448_v2 = vld [vmem:[%s2963_s3 + $0x218] sm:$0xff]  ;;  %v701_v11 = vld [vmem:[%s2965_s5 + $0x48] sm:$0xff] }
  0x40   : > { %574 = vmatpush2.msra.mxu0 %v485_v15  ;;  %644 = vmatprep.subr.mxu1 %v488_v34  ;;  %v447_v3 = vld [vmem:[%s2963_s3 + $0x210] sm:$0xff]  ;;  %v707_v4 = vld [vmem:[%s2965_s5 + $0x78] sm:$0xff]  ;;  %v700_v12 = vld [vmem:[%s2965_s5 + $0x40] sm:$0xff] }
  0x41   : > { %575 = vmatprep.subr.mxu0 %v482_v17  ;;  %645 = vmatpush2.msra.mxu1 %v487_v36  ;;  %v706_v6 = vld [vmem:[%s2965_s5 + $0x70] sm:$0xff]  ;;  %v703_v9 = vld [vmem:[%s2965_s5 + $0x58] sm:$0xff]  ;;  %v697_v15 = vld [vmem:[%s2965_s5 + $0x28] sm:$0xff] }
  0x42   : > { %576 = vmatpush2.msra.mxu0 %v481_v19  ;;  %646 = vmatprep.subr.mxu1 %v484_v38  ;;  %v702_v10 = vld [vmem:[%s2965_s5 + $0x50] sm:$0xff]  ;;  %v699_v13 = vld [vmem:[%s2965_s5 + $0x38] sm:$0xff]  ;;  %v696_v16 = vld [vmem:[%s2965_s5 + $0x20] sm:$0xff] }
  0x43   : > { %577 = vmatprep.subr.mxu0 %v478_v21  ;;  %647 = vmatpush2.msra.mxu1 %v483_v40  ;;  %v698_v14 = vld [vmem:[%s2965_s5 + $0x30] sm:$0xff]  ;;  %v695_v17 = vld [vmem:[%s2965_s5 + $0x18] sm:$0xff]  ;;  %v693_v20 = vld [vmem:[%s2965_s5 + $0x8] sm:$0xff] }
  0x44   : > { %578 = vmatpush2.msra.mxu0 %v477_v23  ;;  %648 = vmatprep.subr.mxu1 %v480_v42  ;;  %v694_v19 = vld [vmem:[%s2965_s5 + $0x10] sm:$0xff]  ;;  %v692_v21 = vld [vmem:[%s2965_s5] sm:$0xff]  ;;  %v2363_v23 = vshrl.u32 %v511_v22, 7 }
  0x45   : > { %579 = vmatprep.subr.mxu0 %v474_v25  ;;  %649 = vmatpush2.msra.mxu1 %v479_v44  ;;  %v509_v25 = vld [vmem:[%s2964_s4] sm:$0xf] }
  0x46   : > { %580 = vmatpush2.msra.mxu0 %v473_v27  ;;  %650 = vmatprep.subr.mxu1 %v476_v46  ;;  %v2366_v24 = vsub.s32 0, %v2363_v23  ;;  %v517_v27 = vsub.s32 1, %v2363_v23 }
  0x47   : > { %581 = vmatprep.subr.mxu0 %v470_v29  ;;  %651 = vmatpush2.msra.mxu1 %v475_v48 }
  0x48   : > { %582 = vmatpush2.msra.mxu0 %v469_v31  ;;  %652 = vmatprep.subr.mxu1 %v472_v50  ;;  %v514_v26 = vrot.slane %v509_v25, %v2366_v24  ;;  %v518_v31 = vrot.slane %v509_v25, %v517_v27 }
  0x49   : > { %583 = vmatprep.subr.mxu0 %v466_v33  ;;  %653 = vmatpush2.msra.mxu1 %v471_v52 }
  0x4a   : > { %584 = vmatpush2.msra.mxu0 %v465_v35  ;;  %654 = vmatprep.subr.mxu1 %v468_v54 }
  0x4b   : > { %585 = vmatprep.subr.mxu0 %v462_v37  ;;  %655 = vmatpush2.msra.mxu1 %v467_v56  ;;  %v525_v37 = vsub.s32 3, %v2363_v23  ;;  %v1827_v56 = vmov 1966171168  }
  0x4c   : > { %586 = vmatpush2.msra.mxu0 %v461_v39  ;;  %656 = vmatprep.subr.mxu1 %v464_v58  ;;  %v521_v39 = vsub.s32 2, %v2363_v23 }
  0x4d   : > { %587 = vmatprep.subr.mxu0 %v458_v41  ;;  %657 = vmatpush2.msra.mxu1 %v463_v59  ;;  %v526_v41 = vrot.slane %v509_v25, %v525_v37  ;;  %v1649_v59 = vld [vmem:[%s2966_s6] ss:$0 sm:$0xff] }
  0x4e   : > { %588 = vmatpush2.msra.mxu0 %v457_v43  ;;  %666 = vmatprep.mubr.f32.mxu1 %v2148_v18  ;;  %v522_v44 = vrot.slane %v509_v25, %v521_v39 }
  0x4f   : > { %589 = vmatprep.subr.mxu0 %v454_v45  ;;  %658 = vmatprep.subr.mxu1 %v460_v60 }
  0x50   : > { %590 = vmatpush2.msra.mxu0 %v453_v47  ;;  %659 = vmatpush2.msra.mxu1 %v459_v61 }
  0x51   : > { %591 = vmatprep.subr.mxu0 %v450_v49  ;;  %660 = vmatprep.subr.mxu1 %v456_v62 }
  0x52   : > { %592 = vmatpush2.msra.mxu0 %v449_v51  ;;  %661 = vmatpush2.msra.mxu1 %v455_v63 }
  0x53   : > { %593 = vmatprep.subr.mxu0 %v446_v53  ;;  %662 = vmatprep.subr.mxu1 %v452_v0 }
  0x54   : > { %594 = vmatpush2.msra.mxu0 %v445_v55  ;;  %663 = vmatpush2.msra.mxu1 %v451_v1 }
  0x55   : > { %596 = vmatmul.mubr.f32.vlgmr.msra.gmra.mxu0 %v379_v57  ;;  %664 = vmatprep.subr.mxu1 %v448_v2 }
  0x56   : > { %665 = vmatpush2.msra.mxu1 %v447_v3  ;;  %1711 = vmatprep.subr.mxu0 %v1825_v5 }
  0x57   : > { %667 = vmatmul.mubr.f32.vlgmr.msra.gmra.mxu1 %v379_v57  ;;  %1283 = vmatprep.subr.mxu1 %v1825_v5  ;;  %v804_v57 = vunpack.c.l.s4 %v1827_v56 }
  0x58   : > { %1712 = vmatpush3.msra.mxu0 %v707_v4  ;;  %1743 = vmatprep.mubr.msk.f32.mxu0 %vm1826_vm0, %v1825_v5  ;;  %v2386_v4 = vld [vmem:[%s2961_s1] sm:$0xff] }
  0x59   : > { %1713 = vmatprep.subr.mxu0 %v1825_v5  ;;  %v805_v58 = vunpack.c.0.s8 %v804_v57  ;;  %v2473_v57 = vld [vmem:[%s2961_s1 + $0x60] sm:$0xff] }
  0x5a   : > { %1714 = vmatpush3.msra.mxu0 %v706_v6 }
  0x5b   : > { %1715 = vmatprep.subr.mxu0 %v1825_v5  ;;  %v808_v60 = vsub.s32 %v805_v58, %v2363_v23  ;;  %v1507_v23 = vld [vmem:[%s2962_s2 + $0x78] sm:$0xff] }
  0x5c   : > { %1716 = vmatpush3.msra.mxu0 %v705_v7 }
  0x5d   : > { %1717 = vmatprep.subr.mxu0 %v1825_v5 }
  0x5e   : > { %1718 = vmatpush3.msra.mxu0 %v704_v8 }
  0x5f   : > { %1719 = vmatprep.subr.mxu0 %v1825_v5 }
  0x60   : > { %1720 = vmatpush3.msra.mxu0 %v703_v9  ;;  %v2392_v9 = vld [vmem:[%s2961_s1 + $0x10] sm:$0xff] }
  0x61   : > { %1721 = vmatprep.subr.mxu0 %v1825_v5 }
  0x62   : > { %1722 = vmatpush3.msra.mxu0 %v702_v10  ;;  %v2397_v10 = vld [vmem:[%s2961_s1 + $0x8] sm:$0xff] }
  0x63   : > { %1723 = vmatprep.subr.mxu0 %v1825_v5 }
  0x64   : > { %1724 = vmatpush3.msra.mxu0 %v701_v11 }
  0x65   : > { %1725 = vmatprep.subr.mxu0 %v1825_v5 }
  0x66   : > { %1726 = vmatpush3.msra.mxu0 %v700_v12 }
  0x67   : > { %1727 = vmatprep.subr.mxu0 %v1825_v5 }
  0x68   : > { %1728 = vmatpush3.msra.mxu0 %v699_v13  ;;  %v2404_v13 = vld [vmem:[%s2961_s1 + $0x18] sm:$0xff] }
  0x69   : > { %1729 = vmatprep.subr.mxu0 %v1825_v5 }
  0x6a   : > { %1730 = vmatpush3.msra.mxu0 %v698_v14 }
  0x6b   : > { %1731 = vmatprep.subr.mxu0 %v1825_v5 }
  0x6c   : > { %1732 = vmatpush3.msra.mxu0 %v697_v15 }
  0x6d   : > { %1733 = vmatprep.subr.mxu0 %v1825_v5 }
  0x6e   : > { %1734 = vmatpush3.msra.mxu0 %v696_v16 }
  0x6f   : > { %1735 = vmatprep.subr.mxu0 %v1825_v5 }
  0x70   : > { %1736 = vmatpush3.msra.mxu0 %v695_v17 }
  0x71   : > { %1737 = vmatprep.subr.mxu0 %v1825_v5 }
  0x72   : > { %1738 = vmatpush3.msra.mxu0 %v694_v19 }
  0x73   : > { %1739 = vmatprep.subr.mxu0 %v1825_v5 }
  0x74   : > { %1740 = vmatpush3.msra.mxu0 %v693_v20  ;;  %v2413_v20 = vld [vmem:[%s2961_s1 + $0x20] sm:$0xff] }
  0x75   : > { %1741 = vmatprep.subr.mxu0 %v1825_v5 }
  0x76   : > { %1742 = vmatpush3.msra.mxu0 %v692_v21 }
 0x115   : > { %v597_v28 = vpop.f32.mrf.mxu0 }
 0x116   : > { %v598_v29 = vadd.f32 %v597_v28, %v514_v26  ;;  %v2420_v28 = vld [vmem:[%s2961_s1 + $0x28] sm:$0xff] }
 0x117   : > { %v599_v32 = vpop.f32.mrf.mxu0  ;;  %v668_v38 = vpop.f32.mrf.mxu1 }
 0x118   : > { %v1647_v30 = vmul.f32 -1.442695, %v598_v29  ;;  %v600_v33 = vadd.f32 %v599_v32, %v518_v31  ;;  %v669_v47 = vadd.f32 %v668_v38, %v522_v44  ;;  %v2450_v44 = vld [vmem:[%s2961_s1 + $0x38] sm:$0xff] }
 0x119   : > { %v670_v42 = vpop.f32.mrf.mxu1 }
 0x11a   : > { %1758 = vpow2.f32 %v1647_v30  ;;  %v1648_v34 = vmul.f32 -1.442695, %v600_v33  ;;  %v671_v45 = vadd.f32 %v670_v42, %v526_v41  ;;  %v2428_v33 = vld [vmem:[%s2961_s1 + $0x40] sm:$0xff]  ;;  %v2443_v41 = vld [vmem:[%s2961_s1 + $0x30] sm:$0xff] }
 0x11c   : > { %1760 = vpow2.f32 %v1648_v34 }
 0x127   : > { %v1759_v35 = vpop.eup %1758 }
 0x128   : > { %v676_v36 = vadd.f32 1.0, %v1759_v35 }
 0x129   : > { %v1761_v40 = vpop.eup %1760 }
 0x12a   : > { %1762 = vrcp.f32 %v676_v36  ;;  %v682_v43 = vadd.f32 1.0, %v1761_v40  ;;  %v2435_v36 = vld [vmem:[%s2961_s1 + $0x48] sm:$0xff] }
 0x12c   : > { %1764 = vrcp.f32 %v682_v43 }
 0x137   : > { %v1763_v46 = vpop.eup %1762 }
 0x138   : > { %v685_v48 = vmul.f32 %v1763_v46, %v671_v45 }
 0x139   : > { %v1765_v50 = vpop.eup %1764 }
 0x13a   : > { %v686_v49 = vadd.f32 %v685_v48, %v669_v47  ;;  %v688_v51 = vsub.f32 1.0, %v1765_v50  ;;  %v690_v54 = vmul.f32 %v1765_v50, %v2148_v18 }
 0x13c   : > { %1766 = vtanh.f32 %v686_v49  ;;  %v2458_v49 = vld [vmem:[%s2961_s1 + $0x50] sm:$0xff] }
 0x149   : > { %v1767_v52 = vpop.eup %1766 }
 0x14a   : > { %v689_v53 = vmul.f32 %v1767_v52, %v688_v51  ;;  %v2465_v52 = vld [vmem:[%s2961_s1 + $0x58] sm:$0xff] }
 0x14c   : > { %v691_v55 = vadd.f32 %v690_v54, %v689_v53 }
 0x14e   : > { %1744 = vmatmul.mubr.f32.vlgmr.msra.gmra.mxu0 %v691_v55  ;;  %1595 = vst [vmem:[#allocation2 + $0x8] sm:$0xff] %v691_v55 }
 0x14f   : > { %1462 = vmatprep.mubr.f32.mxu0 %v1825_v5 }
 0x20e   : > { %v781_v61 = vpop.f32.mrf.mxu0 }
 0x20f   : > { %v782_v62 = vadd.f32 %v1649_v59, %v781_v61 }
 0x210   : > { %v1745_v63 = vpop.f32.mrf.mxu0 }
 0x211   : > { %v802_v0 = vcombine.high %v782_v62, %v782_v62  ;;  %v809_v1 = vrot.slane %v782_v62, %v808_v60 }
 0x213   : > { %v817_v18 = vcombine.high %v809_v1, %v809_v1  ;;  %v825_v2 = vrot.slane %v809_v1, %v808_v60  ;;  %v816_v3 = vrot.slane %v802_v0, %v808_v60  ;;  %v2488_v0 = vld [vmem:[%s2961_s1 + $0x70] sm:$0xff] }
 0x215   : > { %v854_v6 = vrot.slane %v825_v2, %v2366_v24  ;;  %v839_v7 = vrot.slane %v817_v18, %v808_v60  ;;  %v847_v8 = vcombine.high %v825_v2, %v825_v2  ;;  %v832_v14 = vrot.slane %v816_v3, %v808_v60  ;;  %v2495_v2 = vld [vmem:[%s2961_s1 + $0x78] sm:$0xff] }
 0x216   : > { %v818_v26 = vcombine.high %v816_v3, %v816_v3 }
 0x217   : > { %v891_v11 = vmul.f32 %v854_v6, %v2386_v4  ;;  %v858_v12 = vrot.slane %v839_v7, %v2366_v24  ;;  %v892_v17 = vmul.f32 %v854_v6, %v2397_v10  ;;  %v862_v19 = vrot.slane %v847_v8, %v2366_v24 }
 0x218   : > { %v870_v31 = vrot.slane %v832_v14, %v2366_v24  ;;  %v849_v32 = vcombine.high %v839_v7, %v839_v7  ;;  %v846_v40 = vrot.slane %v818_v26, %v808_v60  ;;  %v848_v48 = vcombine.high %v832_v14, %v832_v14  ;;  %v2480_v60 = vld [vmem:[%s2961_s1 + $0x68] sm:$0xff]  ;;  %v1265_v14 = vld [vmem:[%s2967_s7 + $0x78] sm:$0xff]  ;;  %v1258_v26 = vld [vmem:[%s2967_s7 + $0x40] sm:$0xff] }
 0x219   : > { %v908_v15 = vsel %vm907_vm1, %v891_v11, 0.0  ;;  %v893_v16 = vmul.f32 %v858_v12, %v2392_v9  ;;  %v894_v25 = vmul.f32 %v858_v12, %v2404_v13  ;;  %v911_v29 = vsel %vm907_vm1, %v892_v17, 0.0  ;;  %1284 = vmatpush1.msra.mxu1 %v1265_v14  ;;  %v1262_v17 = vld [vmem:[%s2967_s7 + $0x60] sm:$0xff]  ;;  %v1368_v14 = vld [vmem:[%s2969_s9 + $0x70] sm:$0xff] }
 0x21a   : > { %909 = vadd.xlane.f32.xlu0 %v908_v15  ;;  %v895_v30 = vmul.f32 %v862_v19, %v2413_v20  ;;  %v896_v35 = vmul.f32 %v862_v19, %v2420_v28  ;;  %v899_v38 = vmul.f32 %v870_v31, %v2428_v33  ;;  %v866_v39 = vrot.slane %v849_v32, %v2366_v24  ;;  %v1264_v15 = vld [vmem:[%s2967_s7 + $0x70] sm:$0xff]  ;;  %v1261_v19 = vld [vmem:[%s2967_s7 + $0x58] sm:$0xff]  ;;  %v1254_v32 = vld [vmem:[%s2967_s7 + $0x20] sm:$0xff] }
 0x21b   : > { %v914_v21 = vsel %vm907_vm1, %v893_v16, 0.0  ;;  %v917_v34 = vsel %vm907_vm1, %v894_v25, 0.0  ;;  %v900_v43 = vmul.f32 %v870_v31, %v2435_v36  ;;  %v874_v47 = vrot.slane %v846_v40, %v2366_v24  ;;  %1285 = vmatprep.subr.mxu1 %v1825_v5  ;;  %v1263_v16 = vld [vmem:[%s2967_s7 + $0x68] sm:$0xff] }
 0x21c   : > { %915 = vadd.xlane.f32.xlu1 %v914_v21  ;;  %v920_v37 = vsel %vm907_vm1, %v895_v30, 0.0  ;;  %v923_v42 = vsel %vm907_vm1, %v896_v35, 0.0  ;;  %v932_v45 = vsel %vm907_vm1, %v899_v38, 0.0  ;;  %v897_v46 = vmul.f32 %v866_v39, %v2443_v41  ;;  %1286 = vmatpush1.msra.mxu1 %v1264_v15  ;;  %v1260_v21 = vld [vmem:[%s2967_s7 + $0x50] sm:$0xff]  ;;  %v1259_v25 = vld [vmem:[%s2967_s7 + $0x48] sm:$0xff]  ;;  %v1250_v38 = vld [vmem:[%s2967_s7] sm:$0xff] }
 0x21d   : > { %v935_v50 = vsel %vm907_vm1, %v900_v43, 0.0  ;;  %v898_v51 = vmul.f32 %v866_v39, %v2450_v44  ;;  %v901_v54 = vmul.f32 %v874_v47, %v2458_v49  ;;  %v878_v55 = vrot.slane %v848_v48, %v2366_v24  ;;  %1287 = vmatprep.subr.mxu1 %v1825_v5  ;;  %v1256_v30 = vld [vmem:[%s2967_s7 + $0x30] sm:$0xff]  ;;  %v1255_v31 = vld [vmem:[%s2967_s7 + $0x28] sm:$0xff]  ;;  %v1273_v39 = vld [vmem:[%s2967_s7 + $0xb8] sm:$0xff] }
 0x21e   : > { %912 = vadd.xlane.f32.xlu0 %v911_v29  ;;  %v926_v53 = vsel %vm907_vm1, %v897_v46, 0.0  ;;  %v850_v56 = vcombine.high %v846_v40, %v846_v40  ;;  %v902_v59 = vmul.f32 %v874_v47, %v2465_v52  ;;  %1288 = vmatpush1.msra.mxu1 %v1263_v16  ;;  %v1257_v29 = vld [vmem:[%s2967_s7 + $0x38] sm:$0xff]  ;;  %v1252_v35 = vld [vmem:[%s2967_s7 + $0x10] sm:$0xff]  ;;  %v1270_v43 = vld [vmem:[%s2967_s7 + $0xa0] sm:$0xff] }
 0x21f   : > { %v929_v58 = vsel %vm907_vm1, %v898_v51, 0.0  ;;  %v938_v61 = vsel %vm907_vm1, %v901_v54, 0.0  ;;  %v903_v62 = vmul.f32 %v878_v55, %v2473_v57  ;;  %v904_v18 = vmul.f32 %v878_v55, %v2480_v60  ;;  %1289 = vmatprep.subr.mxu1 %v1825_v5  ;;  %v1272_v40 = vld [vmem:[%s2967_s7 + $0xb0] sm:$0xff]  ;;  %v1267_v47 = vld [vmem:[%s2967_s7 + $0x88] sm:$0xff]  ;;  %v1266_v48 = vld [vmem:[%s2967_s7 + $0x80] sm:$0xff] }
 0x220   : > { %918 = vadd.xlane.f32.xlu1 %v917_v34  ;;  %v882_v63 = vrot.slane %v850_v56, %v2366_v24  ;;  %v941_v1 = vsel %vm907_vm1, %v902_v59, 0.0  ;;  %1290 = vmatpush1.msra.mxu1 %v1262_v17  ;;  %v1253_v34 = vld [vmem:[%s2967_s7 + $0x18] sm:$0xff]  ;;  %v1268_v46 = vld [vmem:[%s2967_s7 + $0x90] sm:$0xff]  ;;  %v1382_v54 = vld [vmem:[%s2969_s9 + $0xe0] sm:$0xff] }
 0x221   : > { %v944_v3 = vsel %vm907_vm1, %v903_v62, 0.0  ;;  %v947_v7 = vsel %vm907_vm1, %v904_v18, 0.0  ;;  %1291 = vmatprep.subr.mxu1 %v1825_v5  ;;  %v1384_v51 = vld [vmem:[%s2969_s9 + $0xf0] sm:$0xff]  ;;  %v1379_v56 = vld [vmem:[%s2969_s9 + $0xc8] sm:$0xff]  ;;  %v1377_v59 = vld [vmem:[%s2969_s9 + $0xb8] sm:$0xff] }
 0x222   : > { %921 = vadd.xlane.f32.xlu0 %v920_v37  ;;  %v905_v6 = vmul.f32 %v882_v63, %v2488_v0  ;;  %v906_v8 = vmul.f32 %v882_v63, %v2495_v2  ;;  %1292 = vmatpush1.msra.mxu1 %v1261_v19  ;;  %v1251_v37 = vld [vmem:[%s2967_s7 + $0x8] sm:$0xff]  ;;  %v1380_v55 = vld [vmem:[%s2969_s9 + $0xd0] sm:$0xff]  ;;  %v1374_v63 = vld [vmem:[%s2969_s9 + $0xa0] sm:$0xff] }
 0x223   : > { %1293 = vmatprep.subr.mxu1 %v1825_v5  ;;  %v1375_v62 = vld [vmem:[%s2969_s9 + $0xa8] sm:$0xff]  ;;  %v1366_v19 = vld [vmem:[%s2969_s9 + $0x60] sm:$0xff] }
 0x224   : > { %924 = vadd.xlane.f32.xlu1 %v923_v42  ;;  %v950_v11 = vsel %vm907_vm1, %v905_v6, 0.0  ;;  %v953_v12 = vsel %vm907_vm1, %v906_v8, 0.0  ;;  %1294 = vmatpush1.msra.mxu1 %v1260_v21  ;;  %v1271_v42 = vld [vmem:[%s2967_s7 + $0xa8] sm:$0xff]  ;;  %v1370_v8 = vld [vmem:[%s2969_s9 + $0x80] sm:$0xff] }
 0x225   : > { %1295 = vmatprep.subr.mxu1 %v1825_v5  ;;  %v1371_v6 = vld [vmem:[%s2969_s9 + $0x88] sm:$0xff] }
 0x226   : > { %933 = vadd.xlane.f32.xlu0 %v932_v45  ;;  %1296 = vmatpush1.msra.mxu1 %v1259_v25  ;;  %v1269_v45 = vld [vmem:[%s2967_s7 + $0x98] sm:$0xff]  ;;  %v1367_v16 = vld [vmem:[%s2969_s9 + $0x68] sm:$0xff] }
 0x227   : > { %1297 = vmatprep.subr.mxu1 %v1825_v5 }
 0x228   : > { %936 = vadd.xlane.f32.xlu1 %v935_v50  ;;  %1298 = vmatpush1.msra.mxu1 %v1258_v26  ;;  %v1385_v50 = vld [vmem:[%s2969_s9 + $0xf8] sm:$0xff] }
 0x229   : > { %1299 = vmatprep.subr.mxu1 %v1825_v5  ;;  %1398 = vmatprep.subr.mxu0 %v1385_v50  ;;  %v1365_v26 = vld [vmem:[%s2969_s9 + $0x58] sm:$0xff]  ;;  %v1359_v50 = vld [vmem:[%s2969_s9 + $0x28] sm:$0xff] }
 0x22a   : > { %927 = vadd.xlane.f32.xlu0 %v926_v53  ;;  %1300 = vmatpush1.msra.mxu1 %v1257_v29  ;;  %v1383_v53 = vld [vmem:[%s2969_s9 + $0xe8] sm:$0xff] }
 0x22b   : > { %1301 = vmatprep.subr.mxu1 %v1825_v5  ;;  %1399 = vmatpush1.msra.mxu0 %v1384_v51 }
 0x22c   : > { %930 = vadd.xlane.f32.xlu1 %v929_v58  ;;  %1302 = vmatpush1.msra.mxu1 %v1256_v30  ;;  %v1378_v58 = vld [vmem:[%s2969_s9 + $0xc0] sm:$0xff]  ;;  %v1364_v30 = vld [vmem:[%s2969_s9 + $0x50] sm:$0xff] }
 0x22d   : > { %1303 = vmatprep.subr.mxu1 %v1825_v5  ;;  %1400 = vmatprep.subr.mxu0 %v1383_v53 }
 0x22e   : > { %939 = vadd.xlane.f32.xlu0 %v938_v61  ;;  %1304 = vmatpush1.msra.mxu1 %v1255_v31  ;;  %v1376_v61 = vld [vmem:[%s2969_s9 + $0xb0] sm:$0xff] }
 0x22f   : > { %1305 = vmatprep.subr.mxu1 %v1825_v5  ;;  %1401 = vmatpush1.msra.mxu0 %v1382_v54 }
 0x230   : > { %942 = vadd.xlane.f32.xlu1 %v941_v1  ;;  %1306 = vmatpush1.msra.mxu1 %v1254_v32  ;;  %v1373_v1 = vld [vmem:[%s2969_s9 + $0x98] sm:$0xff] }
 0x231   : > { %1307 = vmatprep.subr.mxu1 %v1825_v5 }
 0x232   : > { %945 = vadd.xlane.f32.xlu0 %v944_v3  ;;  %1308 = vmatpush1.msra.mxu1 %v1253_v34  ;;  %v1372_v3 = vld [vmem:[%s2969_s9 + $0x90] sm:$0xff]  ;;  %v1363_v34 = vld [vmem:[%s2969_s9 + $0x48] sm:$0xff] }
 0x233   : > { %1309 = vmatprep.subr.mxu1 %v1825_v5 }
 0x234   : > { %948 = vadd.xlane.f32.xlu1 %v947_v7  ;;  %1310 = vmatpush1.msra.mxu1 %v1252_v35 }
 0x235   : > { %1311 = vmatprep.subr.mxu1 %v1825_v5 }
 0x236   : > { %951 = vadd.xlane.f32.xlu0 %v950_v11  ;;  %1312 = vmatpush1.msra.mxu1 %v1251_v37  ;;  %v1369_v11 = vld [vmem:[%s2969_s9 + $0x78] sm:$0xff]  ;;  %v1362_v37 = vld [vmem:[%s2969_s9 + $0x40] sm:$0xff] }
 0x237   : > { %1313 = vmatprep.subr.mxu1 %v1825_v5 }
 0x238   : > { %954 = vadd.xlane.f32.xlu1 %v953_v12  ;;  %1314 = vmatpush1.msra.mxu1 %v1250_v38 }
 0x239   : > { %1331 = vmatprep.subr.mxu1 %v1825_v5 }
 0x23a   : > { %1332 = vmatpush2.msra.mxu1 %v1273_v39 }
 0x23b   : > { %1333 = vmatprep.subr.mxu1 %v1825_v5 }
 0x23c   : > { %1334 = vmatpush2.msra.mxu1 %v1272_v40 }
 0x23d   : > { %1335 = vmatprep.subr.mxu1 %v1825_v5 }
 0x23e   : > { %1336 = vmatpush2.msra.mxu1 %v1271_v42  ;;  %v1361_v42 = vld [vmem:[%s2969_s9 + $0x38] sm:$0xff] }
 0x23f   : > { %1337 = vmatprep.subr.mxu1 %v1825_v5 }
 0x240   : > { %1338 = vmatpush2.msra.mxu1 %v1270_v43 }
 0x241   : > { %1339 = vmatprep.subr.mxu1 %v1825_v5 }
 0x242   : > { %1340 = vmatpush2.msra.mxu1 %v1269_v45  ;;  %v1360_v45 = vld [vmem:[%s2969_s9 + $0x30] sm:$0xff] }
 0x243   : > { %1341 = vmatprep.subr.mxu1 %v1825_v5 }
 0x244   : > { %1342 = vmatpush2.msra.mxu1 %v1268_v46 }
 0x245   : > { %1343 = vmatprep.subr.mxu1 %v1825_v5 }
 0x246   : > { %1344 = vmatpush2.msra.mxu1 %v1267_v47 }
 0x247   : > { %1345 = vmatprep.subr.mxu1 %v1825_v5  ;;  %v1381_v5 = vld [vmem:[%s2969_s9 + $0xd8] sm:$0xff] }
 0x248   : > { %1346 = vmatpush2.msra.mxu1 %v1266_v48  ;;  %1402 = vmatprep.subr.mxu0 %v1381_v5 }
 0x249   : > { %1403 = vmatpush1.msra.mxu0 %v1380_v55 }
 0x24a   : > { %1404 = vmatprep.subr.mxu0 %v1379_v56 }
 0x24b   : > { %1405 = vmatpush1.msra.mxu0 %v1378_v58 }
 0x24c   : > { %1406 = vmatprep.subr.mxu0 %v1377_v59 }
 0x24d   : > { %1407 = vmatpush1.msra.mxu0 %v1376_v61 }
 0x24e   : > { %1408 = vmatprep.subr.mxu0 %v1375_v62 }
 0x24f   : > { %1409 = vmatpush1.msra.mxu0 %v1374_v63 }
 0x250   : > { %1410 = vmatprep.subr.mxu0 %v1373_v1 }
 0x251   : > { %1411 = vmatpush1.msra.mxu0 %v1372_v3 }
 0x252   : > { %1412 = vmatprep.subr.mxu0 %v1371_v6 }
 0x253   : > { %1413 = vmatpush1.msra.mxu0 %v1370_v8 }
 0x254   : > { %1414 = vmatprep.subr.mxu0 %v1369_v11 }
 0x255   : > { %1415 = vmatpush1.msra.mxu0 %v1368_v14 }
 0x256   : > { %1416 = vmatprep.subr.mxu0 %v1367_v16 }
 0x257   : > { %1417 = vmatpush1.msra.mxu0 %v1366_v19 }
 0x258   : > { %1418 = vmatprep.subr.mxu0 %v1365_v26 }
 0x259   : > { %1419 = vmatpush1.msra.mxu0 %v1364_v30 }
 0x25a   : > { %1420 = vmatprep.subr.mxu0 %v1363_v34 }
 0x25b   : > { %1421 = vmatpush1.msra.mxu0 %v1362_v37 }
 0x25c   : > { %1422 = vmatprep.subr.mxu0 %v1361_v42 }
 0x25d   : > { %1423 = vmatpush1.msra.mxu0 %v1360_v45 }
 0x25e   : > { %1424 = vmatprep.subr.mxu0 %v1359_v50 }
 0x2a3   : > { %v2637_v18 = vpop.xlane.xlu0 %909 }
 0x2a5   : > { %v2645_v7 = vpop.xlane.xlu1 %915 }
 0x2a7   : > { %v913_v12 = vpop.xlane.xlu0 %912 }
 0x2a8   : > { %v956_v15 = vmax.f32 %v2637_v18, %v913_v12 }
 0x2a9   : > { %v919_v17 = vpop.xlane.xlu1 %918 }
 0x2aa   : > { %v957_v21 = vrot.slane %v956_v15, 4  ;;  %v963_v25 = vmax.f32 %v2645_v7, %v919_v17 }
 0x2ab   : > { %v2667_v29 = vpop.xlane.xlu0 %921 }
 0x2ac   : > { %v958_v31 = vmax.f32 %v956_v15, %v957_v21  ;;  %v964_v32 = vrot.slane %v963_v25, 4 }
 0x2ad   : > { %v2675_v35 = vpop.xlane.xlu1 %924 }
 0x2ae   : > { %v959_v38 = vrot.slane %v958_v31, 2  ;;  %v965_v39 = vmax.f32 %v963_v25, %v964_v32  ;;  %v970_v40 = vmax.f32 %v2667_v29, %v2675_v35 }
 0x2af   : > { %v2685_v43 = vpop.xlane.xlu0 %933 }
 0x2b0   : > { %v960_v46 = vmax.f32 %v958_v31, %v959_v38  ;;  %v966_v47 = vrot.slane %v965_v39, 2  ;;  %v971_v48 = vrot.slane %v970_v40, 4 }
 0x2b1   : > { %v2693_v51 = vpop.xlane.xlu1 %936 }
 0x2b2   : > { %v961_v53 = vrot.slane %v960_v46, 1  ;;  %v967_v54 = vmax.f32 %v965_v39, %v966_v47  ;;  %v972_v5 = vmax.f32 %v970_v40, %v971_v48  ;;  %v984_v55 = vmax.f32 %v2685_v43, %v2693_v51 }
 0x2b3   : > { %v2697_v56 = vpop.xlane.xlu0 %927 }
 0x2b4   : > { %v962_v58 = vmax.f32 %v960_v46, %v961_v53  ;;  %v968_v59 = vrot.slane %v967_v54, 1  ;;  %v973_v61 = vrot.slane %v972_v5, 2  ;;  %v985_v62 = vrot.slane %v984_v55, 4 }
 0x2b5   : > { %v2699_v63 = vpop.xlane.xlu1 %930 }
 0x2b6   : > { %v1012_v1 = vsub.f32 %v2637_v18, %v962_v58  ;;  %v1013_v3 = vsub.f32 %v913_v12, %v962_v58  ;;  %v969_v6 = vmax.f32 %v967_v54, %v968_v59  ;;  %v974_v8 = vmax.f32 %v972_v5, %v973_v61 }
 0x2b7   : > { %v986_v11 = vmax.f32 %v984_v55, %v985_v62  ;;  %v977_v14 = vmax.f32 %v2697_v56, %v2699_v63  ;;  %v2704_v15 = vpop.xlane.xlu0 %939 }
 0x2b8   : > { %v1028_v16 = vmul.f32 1.442695, %v1012_v1  ;;  %v1030_v19 = vmul.f32 1.442695, %v1013_v3  ;;  %v1014_v21 = vsub.f32 %v2645_v7, %v969_v6  ;;  %v1015_v25 = vsub.f32 %v919_v17, %v969_v6 }
 0x2b9   : > { %v975_v26 = vrot.slane %v974_v8, 1  ;;  %v987_v30 = vrot.slane %v986_v11, 2  ;;  %v978_v31 = vrot.slane %v977_v14, 4  ;;  %v943_v32 = vpop.xlane.xlu1 %942 }
 0x2ba   : > { %1768 = vpow2.f32 %v1028_v16  ;;  %v1032_v18 = vmul.f32 1.442695, %v1014_v21  ;;  %v1034_v12 = vmul.f32 1.442695, %v1015_v25  ;;  %v991_v34 = vmax.f32 %v2704_v15, %v943_v32 }
 0x2bb   : > { %1770 = vpow2.f32 %v1030_v19  ;;  %v976_v37 = vmax.f32 %v974_v8, %v975_v26  ;;  %v988_v38 = vmax.f32 %v986_v11, %v987_v30  ;;  %v979_v39 = vmax.f32 %v977_v14, %v978_v31  ;;  %v2708_v42 = vpop.xlane.xlu0 %945 }
 0x2bc   : > { %1772 = vpow2.f32 %v1032_v18  ;;  %v992_v40 = vrot.slane %v991_v34, 4 }
 0x2bd   : > { %1774 = vpow2.f32 %v1034_v12  ;;  %v1016_v7 = vsub.f32 %v2667_v29, %v976_v37  ;;  %v1017_v17 = vsub.f32 %v2675_v35, %v976_v37  ;;  %v989_v45 = vrot.slane %v988_v38, 1  ;;  %v2712_v46 = vpop.xlane.xlu1 %948 }
 0x2be   : > { %v980_v47 = vrot.slane %v979_v39, 2  ;;  %v993_v48 = vmax.f32 %v991_v34, %v992_v40  ;;  %v998_v50 = vmax.f32 %v2708_v42, %v2712_v46 }
 0x2bf   : > { %v1036_v53 = vmul.f32 1.442695, %v1016_v7  ;;  %v1038_v54 = vmul.f32 1.442695, %v1017_v17  ;;  %v990_v5 = vmax.f32 %v988_v38, %v989_v45  ;;  %v952_v6 = vpop.xlane.xlu0 %951 }
 0x2c0   : > { %v981_v55 = vmax.f32 %v979_v39, %v980_v47  ;;  %v994_v58 = vrot.slane %v993_v48, 2  ;;  %v999_v59 = vrot.slane %v998_v50, 4 }
 0x2c1   : > { %1776 = vpow2.f32 %v1036_v53  ;;  %v1020_v61 = vsub.f32 %v2685_v43, %v990_v5  ;;  %v1021_v29 = vsub.f32 %v2693_v51, %v990_v5  ;;  %v2718_v35 = vpop.xlane.xlu1 %954 }
 0x2c2   : > { %1778 = vpow2.f32 %v1038_v54  ;;  %v982_v62 = vrot.slane %v981_v55, 1  ;;  %v995_v1 = vmax.f32 %v993_v48, %v994_v58  ;;  %v1000_v3 = vmax.f32 %v998_v50, %v999_v59 }
 0x2c3   : > { %v1044_v8 = vmul.f32 1.442695, %v1020_v61  ;;  %v1046_v11 = vmul.f32 1.442695, %v1021_v29  ;;  %v1005_v14 = vmax.f32 %v952_v6, %v2718_v35 }
 0x2c4   : > { %v983_v16 = vmax.f32 %v981_v55, %v982_v62  ;;  %v996_v19 = vrot.slane %v995_v1, 1  ;;  %v1001_v21 = vrot.slane %v1000_v3, 2 }
 0x2c5   : > { %1780 = vpow2.f32 %v1044_v8  ;;  %v1006_v25 = vrot.slane %v1005_v14, 4 }
 0x2c6   : > { %1782 = vpow2.f32 %v1046_v11  ;;  %v1018_v43 = vsub.f32 %v2697_v56, %v983_v16  ;;  %v1019_v51 = vsub.f32 %v2699_v63, %v983_v16  ;;  %v997_v26 = vmax.f32 %v995_v1, %v996_v19 }
 0x2c7   : > { %v2723_v30 = vpop.eup %1768  ;;  %v1002_v31 = vmax.f32 %v1000_v3, %v1001_v21  ;;  %v1007_v18 = vmax.f32 %v1005_v14, %v1006_v25 }
 0x2c8   : > { %v2725_v12 = vpop.eup %1770  ;;  %v1040_v34 = vmul.f32 1.442695, %v1018_v43  ;;  %v1042_v37 = vmul.f32 1.442695, %v1019_v51  ;;  %v1022_v38 = vsub.f32 %v2704_v15, %v997_v26  ;;  %v1023_v39 = vsub.f32 %v943_v32, %v997_v26 }
 0x2c9   : > { %v2728_v40 = vpop.eup %1772  ;;  %v1060_v7 = vadd.f32 %v2725_v12, %v2723_v30  ;;  %v1003_v56 = vrot.slane %v1002_v31, 1  ;;  %v1008_v17 = vrot.slane %v1007_v18, 2 }
 0x2ca   : > { %v2732_v63 = vpop.eup %1774  ;;  %1784 = vpow2.f32 %v1040_v34  ;;  %v1048_v45 = vmul.f32 1.442695, %v1022_v38  ;;  %v1050_v47 = vmul.f32 1.442695, %v1023_v39 }
 0x2cb   : > { %v1061_v48 = vrot.slane %v1060_v7, 4  ;;  %v1067_v50 = vadd.f32 %v2732_v63, %v2728_v40  ;;  %1786 = vpow2.f32 %v1042_v37  ;;  %v1004_v53 = vmax.f32 %v1002_v31, %v1003_v56 }
 0x2cc   : > { %1788 = vpow2.f32 %v1048_v45  ;;  %v1009_v15 = vmax.f32 %v1007_v18, %v1008_v17 }
 0x2cd   : > { %v1062_v32 = vadd.f32 %v1061_v48, %v1060_v7  ;;  %v1068_v54 = vrot.slane %v1067_v50, 4  ;;  %1790 = vpow2.f32 %v1050_v47  ;;  %v1024_v5 = vsub.f32 %v2708_v42, %v1004_v53 }
 0x2ce   : > { %v2737_v55 = vpop.eup %1776  ;;  %v1025_v58 = vsub.f32 %v2712_v46, %v1004_v53  ;;  %v1010_v59 = vrot.slane %v1009_v15, 1 }
 0x2cf   : > { %v2740_v61 = vpop.eup %1778  ;;  %v1063_v29 = vrot.slane %v1062_v32, 2  ;;  %v1069_v62 = vadd.f32 %v1068_v54, %v1067_v50  ;;  %v1052_v1 = vmul.f32 1.442695, %v1024_v5 }
 0x2d0   : > { %v1074_v3 = vadd.f32 %v2740_v61, %v2737_v55  ;;  %v1054_v8 = vmul.f32 1.442695, %v1025_v58  ;;  %v1011_v11 = vmax.f32 %v1009_v15, %v1010_v59 }
 0x2d1   : > { %v1064_v14 = vadd.f32 %v1063_v29, %v1062_v32  ;;  %v1070_v16 = vrot.slane %v1069_v62, 2  ;;  %1792 = vpow2.f32 %v1052_v1 }
 0x2d2   : > { %v2744_v19 = vpop.eup %1780  ;;  %v1075_v42 = vrot.slane %v1074_v3, 4  ;;  %1794 = vpow2.f32 %v1054_v8  ;;  %v1026_v21 = vsub.f32 %v952_v6, %v1011_v11  ;;  %v1027_v46 = vsub.f32 %v2718_v35, %v1011_v11 }
 0x2d3   : > { %v2747_v25 = vpop.eup %1782  ;;  %v1065_v43 = vrot.slane %v1064_v14, 1  ;;  %v1071_v51 = vadd.f32 %v1070_v16, %v1069_v62 }
 0x2d4   : > { %v1076_v26 = vadd.f32 %v1075_v42, %v1074_v3  ;;  %v1088_v31 = vadd.f32 %v2747_v25, %v2744_v19  ;;  %v1056_v18 = vmul.f32 1.442695, %v1026_v21  ;;  %v1058_v34 = vmul.f32 1.442695, %v1027_v46 }
 0x2d5   : > { %v1066_v37 = vadd.f32 %v1065_v43, %v1064_v14  ;;  %v1072_v38 = vrot.slane %v1071_v51, 1 }
 0x2d6   : > { %v1077_v39 = vrot.slane %v1076_v26, 2  ;;  %v1089_v7 = vrot.slane %v1088_v31, 4  ;;  %1796 = vpow2.f32 %v1056_v18 }
 0x2d7   : > { %v2751_v56 = vpop.eup %1784  ;;  %1798 = vrcp.f32 %v1066_v37  ;;  %v1073_v6 = vadd.f32 %v1072_v38, %v1071_v51 }
 0x2d8   : > { %v2753_v35 = vpop.eup %1786  ;;  %v1078_v17 = vadd.f32 %v1077_v39, %v1076_v26  ;;  %v1090_v45 = vadd.f32 %v1089_v7, %v1088_v31  ;;  %1800 = vpow2.f32 %v1058_v34 }
 0x2d9   : > { %v2755_v47 = vpop.eup %1788  ;;  %1802 = vrcp.f32 %v1073_v6  ;;  %v1081_v48 = vadd.f32 %v2753_v35, %v2751_v56 }
 0x2da   : > { %v2759_v50 = vpop.eup %1790  ;;  %v1079_v53 = vrot.slane %v1078_v17, 1  ;;  %v1091_v15 = vrot.slane %v1090_v45, 2 }
 0x2db   : > { %v1082_v32 = vrot.slane %v1081_v48, 4  ;;  %v1095_v54 = vadd.f32 %v2759_v50, %v2755_v47 }
 0x2dc   : > { %v1080_v5 = vadd.f32 %v1079_v53, %v1078_v17  ;;  %v1092_v58 = vadd.f32 %v1091_v15, %v1090_v45 }
 0x2dd   : > { %v1083_v59 = vadd.f32 %v1082_v32, %v1081_v48  ;;  %v1096_v29 = vrot.slane %v1095_v54, 4 }
 0x2de   : > { %v2763_v62 = vpop.eup %1792  ;;  %1804 = vrcp.f32 %v1080_v5  ;;  %v1093_v1 = vrot.slane %v1092_v58, 1 }
 0x2df   : > { %v2765_v3 = vpop.eup %1794  ;;  %v1084_v8 = vrot.slane %v1083_v59, 2  ;;  %v1097_v11 = vadd.f32 %v1096_v29, %v1095_v54 }
 0x2e0   : > { %v1094_v14 = vadd.f32 %v1093_v1, %v1092_v58  ;;  %v1102_v16 = vadd.f32 %v2765_v3, %v2763_v62 }
 0x2e1   : > { %v1085_v42 = vadd.f32 %v1084_v8, %v1083_v59  ;;  %v1098_v21 = vrot.slane %v1097_v11, 2 }
 0x2e2   : > { %1806 = vrcp.f32 %v1094_v14  ;;  %v1103_v46 = vrot.slane %v1102_v16, 4 }
 0x2e3   : > { %v2769_v43 = vpop.eup %1796  ;;  %v1086_v51 = vrot.slane %v1085_v42, 1  ;;  %v1099_v26 = vadd.f32 %v1098_v21, %v1097_v11 }
 0x2e4   : > { %v1799_v31 = vpop.eup %1798  ;;  %v1104_v18 = vadd.f32 %v1103_v46, %v1102_v16 }
 0x2e5   : > { %v2771_v34 = vpop.eup %1800  ;;  %v1124_v37 = vmul.f32 %v1799_v31, %v2723_v30  ;;  %v1125_v38 = vmul.f32 %v1799_v31, %v2725_v12  ;;  %v1087_v39 = vadd.f32 %v1086_v51, %v1085_v42  ;;  %v1100_v7 = vrot.slane %v1099_v26, 1 }
 0x2e6   : > { %v1803_v6 = vpop.eup %1802  ;;  %v1105_v17 = vrot.slane %v1104_v18, 2  ;;  %v1109_v45 = vadd.f32 %v2771_v34, %v2769_v43 }
 0x2e7   : > { %v1126_v48 = vmul.f32 %v1803_v6, %v2728_v40  ;;  %v1127_v53 = vmul.f32 %v1803_v6, %v2732_v63  ;;  %1808 = vrcp.f32 %v1087_v39  ;;  %v1101_v15 = vadd.f32 %v1100_v7, %v1099_v26 }
 0x2e8   : > { %v1106_v32 = vadd.f32 %v1105_v17, %v1104_v18  ;;  %v1110_v54 = vrot.slane %v1109_v45, 4  ;;  %v1140_v5 = vmul.f32 %v1124_v37, %v2386_v4  ;;  %v1141_v30 = vmul.f32 %v1125_v38, %v2397_v10 }
 0x2e9   : > { %v1142_v12 = vmul.f32 %v1126_v48, %v2392_v9  ;;  %v1143_v58 = vmul.f32 %v1127_v53, %v2404_v13  ;;  %1810 = vrcp.f32 %v1101_v15 }
 0x2ea   : > { %v1107_v59 = vrot.slane %v1106_v32, 1  ;;  %v1111_v29 = vadd.f32 %v1110_v54, %v1109_v45  ;;  %v1156_v8 = vsel %vm907_vm1, %v1140_v5, 0.0  ;;  %v1157_v11 = vsel %vm907_vm1, %v1141_v30, 0.0 }
 0x2eb   : > { %v1805_v1 = vpop.eup %1804  ;;  %v1165_v10 = vsel %vm907_vm1, %v1142_v12, 0.0  ;;  %v1166_v9 = vsel %vm907_vm1, %v1143_v58, 0.0  ;;  %v1158_v51 = vadd.f32 %v1157_v11, %v1156_v8 }
 0x2ec   : > { %v1128_v40 = vmul.f32 %v1805_v1, %v2737_v55  ;;  %v1129_v63 = vmul.f32 %v1805_v1, %v2740_v61  ;;  %v1108_v14 = vadd.f32 %v1107_v59, %v1106_v32  ;;  %v1112_v4 = vrot.slane %v1111_v29, 2 }
 0x2ed   : > { %v1167_v26 = vadd.f32 %v1166_v9, %v1165_v10  ;;  %v1159_v7 = vrot.slane %v1158_v51, 4 }
 0x2ee   : > { %v1144_v13 = vmul.f32 %v1128_v40, %v2413_v20  ;;  %v1145_v16 = vmul.f32 %v1129_v63, %v2420_v28  ;;  %1812 = vrcp.f32 %v1108_v14  ;;  %v1113_v21 = vadd.f32 %v1112_v4, %v1111_v29 }
 0x2ef   : > { %v1807_v42 = vpop.eup %1806  ;;  %v1168_v6 = vrot.slane %v1167_v26, 4  ;;  %v1160_v54 = vadd.f32 %v1159_v7, %v1158_v51 }
 0x2f0   : > { %v1174_v55 = vsel %vm907_vm1, %v1144_v13, 0.0  ;;  %v1175_v61 = vsel %vm907_vm1, %v1145_v16, 0.0  ;;  %v1132_v46 = vmul.f32 %v1807_v42, %v2744_v19  ;;  %v1133_v31 = vmul.f32 %v1807_v42, %v2747_v25 }
 0x2f1   : > { %v1114_v18 = vrot.slane %v1113_v21, 1  ;;  %v1176_v38 = vadd.f32 %v1175_v61, %v1174_v55  ;;  %v1169_v5 = vadd.f32 %v1168_v6, %v1167_v26  ;;  %v1161_v8 = vrot.slane %v1160_v54, 2 }
 0x2f2   : > { %v1148_v37 = vmul.f32 %v1132_v46, %v2428_v33  ;;  %v1149_v20 = vmul.f32 %v1133_v31, %v2435_v36 }
 0x2f3   : > { %v1115_v28 = vadd.f32 %v1114_v18, %v1113_v21  ;;  %v1177_v53 = vrot.slane %v1176_v38, 4  ;;  %v1170_v11 = vrot.slane %v1169_v5, 2 }
 0x2f4   : > { %v1809_v39 = vpop.eup %1808  ;;  %v1193_v17 = vsel %vm907_vm1, %v1149_v20, 0.0  ;;  %v1192_v48 = vsel %vm907_vm1, %v1148_v37, 0.0 }
 0x2f5   : > { %1814 = vrcp.f32 %v1115_v28  ;;  %v1130_v45 = vmul.f32 %v1809_v39, %v2751_v56  ;;  %v1131_v19 = vmul.f32 %v1809_v39, %v2753_v35  ;;  %v1194_v30 = vadd.f32 %v1193_v17, %v1192_v48 }
 0x2f6   : > { %v1811_v25 = vpop.eup %1810  ;;  %v1178_v29 = vadd.f32 %v1177_v53, %v1176_v38 }
 0x2f7   : > { %v1146_v33 = vmul.f32 %v1130_v45, %v2443_v41  ;;  %v1147_v15 = vmul.f32 %v1131_v19, %v2450_v44  ;;  %v1134_v36 = vmul.f32 %v1811_v25, %v2755_v47  ;;  %v1135_v32 = vmul.f32 %v1811_v25, %v2759_v50 }
 0x2f8   : > { %v1195_v63 = vrot.slane %v1194_v30, 4  ;;  %v1179_v4 = vrot.slane %v1178_v29, 2 }
 0x2f9   : > { %v1183_v12 = vsel %vm907_vm1, %v1146_v33, 0.0  ;;  %v1184_v56 = vsel %vm907_vm1, %v1147_v15, 0.0  ;;  %v1151_v35 = vmul.f32 %v1135_v32, %v2465_v52  ;;  %v1150_v58 = vmul.f32 %v1134_v36, %v2458_v49 }
 0x2fa   : > { %v1185_v59 = vadd.f32 %v1184_v56, %v1183_v12  ;;  %v1196_v16 = vadd.f32 %v1195_v63, %v1194_v30  ;;  %v1180_v26 = vadd.f32 %v1179_v4, %v1178_v29  ;;  %v1355_v4 = vld [vmem:[%s2969_s9 + $0x8] sm:$0xff] }
 0x2fb   : > { %v1813_v41 = vpop.eup %1812  ;;  %v1201_v44 = vsel %vm907_vm1, %v1150_v58, 0.0  ;;  %v1202_v47 = vsel %vm907_vm1, %v1151_v35, 0.0 }
 0x2fc   : > { %v1136_v50 = vmul.f32 %v1813_v41, %v2763_v62  ;;  %v1137_v1 = vmul.f32 %v1813_v41, %v2765_v3  ;;  %v1186_v40 = vrot.slane %v1185_v59, 4  ;;  %v1203_v14 = vadd.f32 %v1202_v47, %v1201_v44 }
 0x2fd   : > { %v1171_v3 = vadd.f32 %v1170_v11, %v1169_v5  ;;  %v1197_v20 = vrot.slane %v1196_v16, 2  ;;  %v1181_v6 = vrot.slane %v1180_v26, 1  ;;  %v1816_v11 = vld [vmem:[#allocation2 + $0x8] sm:$0xff] }
 0x2fe   : > { %v1153_v52 = vmul.f32 %v1137_v1, %v2480_v60  ;;  %v1152_v49 = vmul.f32 %v1136_v50, %v2473_v57  ;;  %v1187_v10 = vadd.f32 %v1186_v40, %v1185_v59  ;;  %v1204_v9 = vrot.slane %v1203_v14, 4 }
 0x2ff   : > { %v1162_v60 = vadd.f32 %v1161_v8, %v1160_v54  ;;  %v1172_v28 = vrot.slane %v1171_v3, 1  ;;  %v1198_v25 = vadd.f32 %v1197_v20, %v1196_v16  ;;  %v1519_v20 = vld [vmem:[%s2962_s2 + $0xd8] sm:$0xff] }
 0x300   : > { %v1188_v13 = vrot.slane %v1187_v10, 2  ;;  %v1210_v42 = vsel %vm907_vm1, %v1152_v49, 0.0  ;;  %v1211_v62 = vsel %vm907_vm1, %v1153_v52, 0.0  ;;  %v1205_v55 = vadd.f32 %v1204_v9, %v1203_v14  ;;  %v1358_v14 = vld [vmem:[%s2969_s9 + $0x20] sm:$0xff]  ;;  %v1357_v52 = vld [vmem:[%s2969_s9 + $0x18] sm:$0xff]  ;;  %v1356_v49 = vld [vmem:[%s2969_s9 + $0x10] sm:$0xff] }
 0x301   : > { %v1212_v61 = vadd.f32 %v1211_v62, %v1210_v42  ;;  %v1163_v7 = vrot.slane %v1162_v60, 1  ;;  %v1173_v53 = vadd.f32 %v1172_v28, %v1171_v3  ;;  %v1199_v5 = vrot.slane %v1198_v25, 1  ;;  %1425 = vmatpush1.msra.mxu0 %v1358_v14  ;;  %v1650_v9 = vld [vmem:[%s2968_s8] ss:$0 sm:$0xff]  ;;  %v1503_v28 = vld [vmem:[%s2962_s2 + $0x58] sm:$0xff] }
 0x302   : > { %v1815_v21 = vpop.eup %1814  ;;  %v1189_v57 = vadd.f32 %v1188_v13, %v1187_v10  ;;  %v1206_v31 = vrot.slane %v1205_v55, 2  ;;  %1426 = vmatprep.subr.mxu0 %v1357_v52  ;;  %v1354_v10 = vld [vmem:[%s2969_s9] sm:$0xff] }
 0x303   : > { %v1139_v46 = vmul.f32 %v1815_v21, %v2771_v34  ;;  %v1138_v51 = vmul.f32 %v1815_v21, %v2769_v43  ;;  %v1213_v18 = vrot.slane %v1212_v61, 4  ;;  %v1200_v41 = vadd.f32 %v1199_v5, %v1198_v25  ;;  %1427 = vmatpush1.msra.mxu0 %v1356_v49  ;;  %v1386_v21 = vld [vmem:[%s2970_s10] sm:$0x3]  ;;  %v1498_v25 = vld [vmem:[%s2962_s2 + $0x30] sm:$0xff]  ;;  %v1509_v5 = vld [vmem:[%s2962_s2 + $0x88] sm:$0xff] }
 0x304   : > { %v1190_v45 = vrot.slane %v1189_v57, 1  ;;  %v1207_v43 = vadd.f32 %v1206_v31, %v1205_v55  ;;  %1428 = vmatprep.subr.mxu0 %v1355_v4  ;;  %v1391_v3 = vrot.slane %v1386_v21, %v2366_v24  ;;  %v1395_v55 = vrot.slane %v1386_v21, %v517_v27  ;;  %v1523_v24 = vld [vmem:[%s2962_s2 + $0xf8] sm:$0xff]  ;;  %v1522_v27 = vld [vmem:[%s2962_s2 + $0xf0] sm:$0xff]  ;;  %v1521_v31 = vld [vmem:[%s2962_s2 + $0xe8] sm:$0xff] }
 0x305   : > { %v1154_v37 = vmul.f32 %v1138_v51, %v2488_v0  ;;  %v1155_v38 = vmul.f32 %v1139_v46, %v2495_v2  ;;  %v1214_v39 = vadd.f32 %v1213_v18, %v1212_v61  ;;  %v1182_v0 = vadd.f32 %v1181_v6, %v1180_v26  ;;  %1429 = vmatpush1.msra.mxu0 %v1354_v10  ;;  %v1505_v18 = vld [vmem:[%s2962_s2 + $0x68] sm:$0xff] }
 0x306   : > { %v1164_v2 = vadd.f32 %v1163_v7, %v1162_v60  ;;  %v1191_v36 = vadd.f32 %v1190_v45, %v1189_v57  ;;  %v1208_v32 = vrot.slane %v1207_v43, 1  ;;  %1676 = vmatprep.subr.mxu1 %v1523_v24  ;;  %v1506_v57 = vld [vmem:[%s2962_s2 + $0x70] sm:$0xff]  ;;  %v1517_v6 = vld [vmem:[%s2962_s2 + $0xc8] sm:$0xff]  ;;  %v1500_v45 = vld [vmem:[%s2962_s2 + $0x40] sm:$0xff] }
 0x307   : > { %v1219_v17 = vsel %vm907_vm1, %v1154_v37, 0.0  ;;  %v1220_v34 = vsel %vm907_vm1, %v1155_v38, 0.0  ;;  %v1215_v19 = vrot.slane %v1214_v39, 2  ;;  %v1520_v37 = vld [vmem:[%s2962_s2 + $0xe0] sm:$0xff]  ;;  %v1502_v7 = vld [vmem:[%s2962_s2 + $0x50] sm:$0xff] }
 0x308   : > { %v1221_v48 = vadd.f32 %v1220_v34, %v1219_v17  ;;  %v1237_v56 = vsel %vm1236_vm2, %v1173_v53, %v1164_v2  ;;  %v1209_v58 = vadd.f32 %v1208_v32, %v1207_v43  ;;  %v1504_v38 = vld [vmem:[%s2962_s2 + $0x60] sm:$0xff]  ;;  %v1501_v17 = vld [vmem:[%s2962_s2 + $0x48] sm:$0xff]  ;;  %v1515_v43 = vld [vmem:[%s2962_s2 + $0xb8] sm:$0xff] }
 0x309   : > { %v1216_v33 = vadd.f32 %v1215_v19, %v1214_v39  ;;  %v1239_v35 = vsel %vm1238_vm3, %v1182_v0, %v1237_v56  ;;  %v1518_v39 = vld [vmem:[%s2962_s2 + $0xd0] sm:$0xff]  ;;  %v1516_v34 = vld [vmem:[%s2962_s2 + $0xc0] sm:$0xff]  ;;  %v1499_v19 = vld [vmem:[%s2962_s2 + $0x38] sm:$0xff] }
 0x30a   : > { %v1222_v15 = vrot.slane %v1221_v48, 4  ;;  %v1241_v29 = vsel %vm1240_vm4, %v1191_v36, %v1239_v35  ;;  %v1513_v53 = vld [vmem:[%s2962_s2 + $0xa8] sm:$0xff]  ;;  %v1496_v0 = vld [vmem:[%s2962_s2 + $0x20] sm:$0xff]  ;;  %v1511_v2 = vld [vmem:[%s2962_s2 + $0x98] sm:$0xff] }
 0x30b   : > { %v1217_v30 = vrot.slane %v1216_v33, 1  ;;  %v1243_v50 = vsel %vm1242_vm5, %v1200_v41, %v1241_v29  ;;  %v1495_v36 = vld [vmem:[%s2962_s2 + $0x18] sm:$0xff]  ;;  %v1510_v32 = vld [vmem:[%s2962_s2 + $0x90] sm:$0xff] }
 0x30c   : > { %v1223_v54 = vadd.f32 %v1222_v15, %v1221_v48  ;;  %v1245_v40 = vsel %vm1244_vm6, %v1209_v58, %v1243_v50  ;;  %v1514_v48 = vld [vmem:[%s2962_s2 + $0xb0] sm:$0xff]  ;;  %v1512_v15 = vld [vmem:[%s2962_s2 + $0xa0] sm:$0xff] }
 0x30d   : > { %v1218_v44 = vadd.f32 %v1217_v30, %v1216_v33  ;;  %v1497_v33 = vld [vmem:[%s2962_s2 + $0x28] sm:$0xff] }
 0x30e   : > { %v1224_v12 = vrot.slane %v1223_v54, 2  ;;  %v1493_v30 = vld [vmem:[%s2962_s2 + $0x8] sm:$0xff] }
 0x30f   : > { %v1247_v63 = vsel %vm1246_vm7, %v1218_v44, %v1245_v40 }
 0x310   : > { %v1225_v59 = vadd.f32 %v1224_v12, %v1223_v54  ;;  %v1494_v54 = vld [vmem:[%s2962_s2 + $0x10] sm:$0xff]  ;;  %v1472_v12 = vand.u32 127, %v511_v22  ;;  %v1492_v22 = vld [vmem:[%s2962_s2] sm:$0xff] }
 0x312   : > { %v1226_v47 = vrot.slane %v1225_v59, 1  ;;  %v1473_v56 = vadd.s32 128, %v1472_v12  ;;  %v1474_v35 = vcvt.s32.f32 %v1472_v12 }
 0x314   : > { %v1227_v1 = vadd.f32 %v1226_v47, %v1225_v59  ;;  %v1475_v58 = vcvt.s32.f32 %v1473_v56  ;;  %v1508_v47 = vld [vmem:[%s2962_s2 + $0x80] sm:$0xff] }
 0x316   : > { %v1249_v8 = vsel %vm1248_vm8, %v1227_v1, %v1247_v63  ;;  %v1828_v1 = vmov 1.0  }
 0x317   : > { %1651 = vmatprep.mubr.msk.f32.mxu1 %vm907_vm1, %v1249_v8 }
 0x318   : > { %1348 = vmatmul.mubr.f32.vlgmr.msra.gmra.mxu1 %v1816_v11 }
 0x319   : > { %1677 = vmatpush3.msra.mxu1 %v1507_v23 }
 0x31a   : > { %1678 = vmatprep.subr.mxu1 %v1522_v27 }
 0x31b   : > { %1679 = vmatpush3.msra.mxu1 %v1506_v57 }
 0x31c   : > { %1680 = vmatprep.subr.mxu1 %v1521_v31 }
 0x31d   : > { %1681 = vmatpush3.msra.mxu1 %v1505_v18 }
 0x31e   : > { %1682 = vmatprep.subr.mxu1 %v1520_v37 }
 0x31f   : > { %1683 = vmatpush3.msra.mxu1 %v1504_v38 }
 0x320   : > { %1684 = vmatprep.subr.mxu1 %v1519_v20 }
 0x321   : > { %1685 = vmatpush3.msra.mxu1 %v1503_v28 }
 0x322   : > { %1686 = vmatprep.subr.mxu1 %v1518_v39 }
 0x323   : > { %1687 = vmatpush3.msra.mxu1 %v1502_v7 }
 0x324   : > { %1688 = vmatprep.subr.mxu1 %v1517_v6 }
 0x325   : > { %1689 = vmatpush3.msra.mxu1 %v1501_v17 }
 0x326   : > { %1690 = vmatprep.subr.mxu1 %v1516_v34 }
 0x327   : > { %1691 = vmatpush3.msra.mxu1 %v1500_v45 }
 0x328   : > { %1692 = vmatprep.subr.mxu1 %v1515_v43 }
 0x329   : > { %1693 = vmatpush3.msra.mxu1 %v1499_v19 }
 0x32a   : > { %1694 = vmatprep.subr.mxu1 %v1514_v48 }
 0x32b   : > { %1695 = vmatpush3.msra.mxu1 %v1498_v25 }
 0x32c   : > { %1696 = vmatprep.subr.mxu1 %v1513_v53 }
 0x32d   : > { %1697 = vmatpush3.msra.mxu1 %v1497_v33 }
 0x32e   : > { %1698 = vmatprep.subr.mxu1 %v1512_v15 }
 0x32f   : > { %1699 = vmatpush3.msra.mxu1 %v1496_v0 }
 0x330   : > { %1700 = vmatprep.subr.mxu1 %v1511_v2 }
 0x331   : > { %1701 = vmatpush3.msra.mxu1 %v1495_v36 }
 0x332   : > { %1702 = vmatprep.subr.mxu1 %v1510_v32 }
 0x333   : > { %1703 = vmatpush3.msra.mxu1 %v1494_v54 }
 0x334   : > { %1704 = vmatprep.subr.mxu1 %v1509_v5 }
 0x335   : > { %1705 = vmatpush3.msra.mxu1 %v1493_v30 }
 0x336   : > { %1706 = vmatprep.subr.mxu1 %v1508_v47 }
 0x337   : > { %1707 = vmatpush3.msra.mxu1 %v1492_v22 }
 0x3d8   : > { %v1349_v13 = vpop.f32.mrf.mxu1 }
 0x3d9   : > { %v1350_v16 = vadd.f32 %v1650_v9, %v1349_v13 }
 0x3da   : > { %v1351_v42 = vpop.f32.mrf.mxu1 }
 0x3db   : > { %v1353_v62 = vmax.f32 %v1350_v16, 0.0 }
 0x3dd   : > { %1463 = vmatmul.mubr.f32.vlgmr.msra.gmra.mxu0 %v1353_v62 }
 0x49d   : > { %v1464_v61 = vpop.f32.mrf.mxu0 }
 0x49e   : > { %v2848_v46 = vadd.f32 %v1464_v61, %v1391_v3 }
 0x49f   : > { %v1466_v51 = vpop.f32.mrf.mxu0 }
 0x4a0   : > { %1469 = vst [vmem:[%s1900_s23] sm:$0xff] %v2848_v46  ;;  %v2852_v60 = vadd.f32 %v1466_v51, %v1395_v55 }
 0x4a2   : > { %1470 = vst [vmem:[%s1900_s23 + $0x8] sm:$0xff] %v2852_v60  ;;  %v1476_v26 = vmax.f32 %v2848_v46, %v2852_v60 }
 0x4a4   : > { %1477 = vmax.xlane.f32.xlu0 %v1476_v26 }
 0x52d   : > { %v1478_v59 = vpop.xlane.xlu0 %1477 }
 0x52e   : > { %vm1479_vm9 = vcmp.eq.f32.partialorder %v2848_v46, %v1478_v59  ;;  %vm1480_vm10 = vcmp.eq.f32.partialorder %v2852_v60, %v1478_v59 }
 0x52f   : > { %v1481_v29 = vsel %vm1479_vm9, %v1474_v35, 256.0  ;;  %v1482_v41 = vsel %vm1480_vm10, %v1475_v58, 256.0 }
 0x530   : > { %v1483_v44 = vmin.f32 %v1481_v29, %v1482_v41 }
 0x532   : > { %1484 = vmin.xlane.f32.xlu1 %v1483_v44 }
 0x5bb   : > { %v1485_v50 = vpop.xlane.xlu1 %1484 }
 0x5bc   : > { %vm1486_vm11 = vcmp.eq.f32.partialorder %v1474_v35, %v1485_v50  ;;  %vm1487_vm12 = vcmp.eq.f32.partialorder %v1475_v58, %v1485_v50 }
 0x5bd   : > { %1654 = vmatprep.mubr.msk.f32.mxu1 %vm1487_vm12, %v1828_v1 }
 0x5be   : > { %1655 = vmatmul.mubr.msk.f32.vlgmr.msra.gmra.mxu1 %vm1486_vm11, %v1828_v1 }
 0x67e   : > { %v1708_v40 = vpop.f32.mrf.mxu1 }
 0x680   : > { %v1709_v63 = vpop.f32.mrf.mxu1 }
 0x681   : > { %v1710_v8 = vadd.f32 %v1709_v63, %v1708_v40 }
 0x683   : > { %1594 = vst [vmem:[#allocation2] sm:$0xff] %v1710_v8 }
 0x684 PF: > { %s21_s17 = sadd.s32 1, %s1823_s17  }
 0x685   : > { %p18_p5 = scmp.ge.s32.totalorder %s21_s17, 10  }
 0x687   :  { %20 = sbr.rel (!%p18_p5) target bundleno = 1 (0x1), region = 95 }

</bundles_post_ra>
